<compile_context>
chip_gen: v5e
topology: v5e:2x2
jax: 0.10.0
libtpu: 0.0.40
codegen_flags: <defaults>
</compile_context>

<pallas_src>
import math

import jax
import jax.numpy as jnp
from jax.experimental import pallas as pl
from jax.experimental.pallas import tpu as pltpu


# ------------------------------ small helpers ------------------------------ #

def _round_up(x, m):
    return ((x + m - 1) // m) * m


def _fc_tile(vocab_size):
    """(TILE_V, V_pad): lane tile used to stream the FC weight over vocab."""
    tile = 512 if vocab_size > 512 else _round_up(max(vocab_size, 1), 128)
    v_pad = _round_up(vocab_size, tile)
    return tile, v_pad


# ------------------------------ fused kernel ------------------------------- #

def _make_decoder_kernel(num_layers, hidden_dim, inv_scale):
    """Fused decode step; grid axis = vocab tiles of the FC projection."""
    n_in = 4 + 3 * num_layers + 3   # x, h0, c0, enc, (w_ih,w_hh,b)*L, wfc_h, wfc_c, bfc

    def kernel(*refs):
        in_refs = refs[:n_in]
        pred_ref, h_out_ref, c_out_ref = refs[n_in:n_in + 3]
        top_sc, ctx_sc = refs[n_in + 3:]

        x_ref, h0_ref, c0_ref, enc_ref = in_refs[:4]
        layer_refs = in_refs[4:4 + 3 * num_layers]
        wfc_h_ref, wfc_c_ref, bfc_ref = in_refs[4 + 3 * num_layers:]

        # ---- LSTM (all layers, 1 timestep) + attention: first vocab tile only.
        # Results persist in VMEM scratch across the remaining vocab tiles.
        @pl.when(pl.program_id(0) == 0)
        def _():
            x = x_ref[...]                               # (Bp, E) bf16
            h_top = None
            for l in range(num_layers):
                w_ih_ref = layer_refs[3 * l]             # (4, in, H) bf16, gate-major
                w_hh_ref = layer_refs[3 * l + 1]         # (4, H, H)  bf16, gate-major
                b_ref = layer_refs[3 * l + 2]            # (4, 1, H)  f32 (= b_ih+b_hh)
                h_prev = h0_ref[l].astype(jnp.bfloat16)  # (Bp, H)
                c_prev = c0_ref[l]                       # (Bp, H) f32

                def gate(g):                              # lane-aligned (Bp, H)
                    return (jnp.dot(x, w_ih_ref[g],
                                    preferred_element_type=jnp.float32)
                            + jnp.dot(h_prev, w_hh_ref[g],
                                      preferred_element_type=jnp.float32)
                            + b_ref[g])

                i_g = jax.nn.sigmoid(gate(0))            # PyTorch gate order i|f|g|o
                f_g = jax.nn.sigmoid(gate(1))
                g_g = jnp.tanh(gate(2))
                o_g = jax.nn.sigmoid(gate(3))

                c_new = f_g * c_prev + i_g * g_g
                h_new = o_g * jnp.tanh(c_new)

                h_out_ref[l] = h_new
                c_out_ref[l] = c_new
                x = h_new.astype(jnp.bfloat16)           # feeds next layer
                h_top = h_new
                # TODO(synk): inter-layer LSTM dropout omitted (inference).

            top_sc[...] = h_top                          # (Bp, H) f32

            # Scaled dot-product attention; query = hidden[-1] (== lstm_output).
            # TODO(synk): tile over S (online softmax) if S*H outgrows VMEM.
            enc = enc_ref[...].astype(jnp.float32)       # (Bp, S, H)
            q = h_top * inv_scale                        # scale folded into query
            energy = jnp.sum(q[:, None, :] * enc, axis=-1)          # (Bp, S)
            m = jnp.max(energy, axis=-1, keepdims=True)
            e = jnp.exp(energy - m)
            denom = jnp.sum(e, axis=-1, keepdims=True)
            attn = e * pl.reciprocal(denom, approx=True)             # EUP divide
            ctx_sc[...] = jnp.sum(attn[:, :, None] * enc, axis=1)    # (Bp, H)

        # ---- FC projection for THIS vocab tile (runs every grid step). ----
        pred_ref[...] = (
            jnp.dot(top_sc[...].astype(jnp.bfloat16), wfc_h_ref[...],
                    preferred_element_type=jnp.float32)
            + jnp.dot(ctx_sc[...].astype(jnp.bfloat16), wfc_c_ref[...],
                      preferred_element_type=jnp.float32)
            + bfc_ref[...])

    return kernel


# ----------------------- hoisted (one-time) preparation -------------------- #

def prepare_decoder_weights(params):
    """Per-model prep (run ONCE, not per decode step): gate-major bf16 LSTM
    weights, FC weight transposed/split/vocab-padded in bf16."""
    four_h = params["lstm"][0]["w_ih"].shape[0]
    H = four_h // 4
    layers = []
    for lp in params["lstm"]:
        in_dim = lp["w_ih"].shape[1]
        # PyTorch (4H, in) -> gate-major (4, in, H): each gate matmul output is
        # its own lane-aligned tile (no sub-128-lane slicing of a fused 4H row).
        w_ih = lp["w_ih"].reshape(4, H, in_dim).transpose(0, 2, 1).astype(jnp.bfloat16)
        w_hh = lp["w_hh"].reshape(4, H, H).transpose(0, 2, 1).astype(jnp.bfloat16)
        bias = (lp["b_ih"] + lp["b_hh"]).reshape(4, 1, H).astype(jnp.float32)
        layers.append({"w_ih": w_ih, "w_hh": w_hh, "bias": bias})

    V = params["w_fc"].shape[0]
    tile_v, v_pad = _fc_tile(V)
    w_fc_t = params["w_fc"].T                                       # (2H, V)
    pad_v = ((0, 0), (0, v_pad - V))
    return {
        "layers": layers,
        "w_fc_h": jnp.pad(w_fc_t[:H], pad_v).astype(jnp.bfloat16),  # (H, Vp)
        "w_fc_c": jnp.pad(w_fc_t[H:], pad_v).astype(jnp.bfloat16),  # (H, Vp)
        "b_fc": jnp.pad(params["b_fc"].reshape(1, V), pad_v),        # (1, Vp) f32
        "embedding": params["embedding"],                            # (V, E) f32
        "hidden_dim": H,
        "vocab_size": V,
        "v_pad": v_pad,
        "tile_v": tile_v,
    }


def prepare_encoder_outputs(encoder_outputs, b_pad):
    """Per-sequence prep (run once per source sentence, not per token)."""
    B = encoder_outputs.shape[0]
    return jnp.pad(encoder_outputs,
                   ((0, b_pad - B), (0, 0), (0, 0))).astype(jnp.bfloat16)


# ------------------------------- decode step ------------------------------- #

def decoder_step(prep, x_ids, hidden, cell, enc_prep):
    """One fused decode step.

    x_ids:    [B] int32 token ids
    hidden, cell: [L, B, H] f32 previous LSTM state
    enc_prep: [Bp, S, H] bf16 (from prepare_encoder_outputs)
    Returns (prediction [B, 1, V], hidden [L, B, H], cell [L, B, H]).
    """
    L, B, H = hidden.shape
    B_pad = enc_prep.shape[0]
    V, V_pad, TILE_V = prep["vocab_size"], prep["v_pad"], prep["tile_v"]

    # Embedding lookup (single XLA gather) + batch pad + bf16 for the MXU.
    # TODO(synk): could be folded into the kernel (scalar-prefetch ids +
    # pl.Element row gather on the embedding table) to drop one dispatch/token.
    x_emb = jnp.take(prep["embedding"], x_ids, axis=0)               # [B, E]
    x_p = jnp.pad(x_emb, ((0, B_pad - B), (0, 0))).astype(jnp.bfloat16)
    h_p = jnp.pad(hidden, ((0, 0), (0, B_pad - B), (0, 0)))
    c_p = jnp.pad(cell, ((0, 0), (0, B_pad - B), (0, 0)))

    inputs = [x_p, h_p, c_p, enc_prep]
    for lp in prep["layers"]:
        inputs += [lp["w_ih"], lp["w_hh"], lp["bias"]]
    inputs += [prep["w_fc_h"], prep["w_fc_c"], prep["b_fc"]]

    def resident(a):                 # whole array, VMEM-resident across vocab tiles
        nd = a.ndim
        return pl.BlockSpec(a.shape, lambda j, _nd=nd: (0,) * _nd)

    n_resident = 4 + 3 * L
    in_specs = [resident(a) for a in inputs[:n_resident]]
    in_specs += [
        pl.BlockSpec((H, TILE_V), lambda j: (0, j)),      # w_fc_h: streamed
        pl.BlockSpec((H, TILE_V), lambda j: (0, j)),      # w_fc_c: streamed
        pl.BlockSpec((1, TILE_V), lambda j: (0, j)),      # b_fc:   streamed
    ]

    out_shapes = (
        jax.ShapeDtypeStruct((B_pad, V_pad), jnp.float32),            # prediction
        jax.ShapeDtypeStruct((L, B_pad, H), jnp.float32),             # hidden
        jax.ShapeDtypeStruct((L, B_pad, H), jnp.float32),             # cell
    )
    out_specs = [
        pl.BlockSpec((B_pad, TILE_V), lambda j: (0, j)),              # lane-dense
        pl.BlockSpec((L, B_pad, H), lambda j: (0, 0, 0)),
        pl.BlockSpec((L, B_pad, H), lambda j: (0, 0, 0)),
    ]

    kernel = _make_decoder_kernel(L, H, 1.0 / math.sqrt(H))

    pred_p, h_out_p, c_out_p = pl.pallas_call(
        kernel,
        out_shape=out_shapes,
        grid_spec=pltpu.PrefetchScalarGridSpec(
            num_scalar_prefetch=0,
            grid=(V_pad // TILE_V,),
            in_specs=in_specs,
            out_specs=out_specs,
            scratch_shapes=[pltpu.VMEM((B_pad, H), jnp.float32),      # lstm top
                            pltpu.VMEM((B_pad, H), jnp.float32)],     # context
        ),
        # In-place LSTM state update: h0 -> h_out, c0 -> c_out.
        input_output_aliases={1: 1, 2: 2},
        # Vocab axis must stay "arbitrary": scratch carries LSTM/attention
        # results across vocab tiles. (On v7x, mark "parallel" and recompute
        # the tiny LSTM/attention per core to split FC tiles across both TCs.)
        compiler_params=pltpu.CompilerParams(
            dimension_semantics=("arbitrary",),
            vmem_limit_bytes=48 * 1024 * 1024),
    )(*inputs)

    prediction = pred_p[:B, :V][:, None, :]                           # [B, 1, V]
    return prediction, h_out_p[:, :B, :], c_out_p[:, :B, :]


def decoder_forward(params, x_ids, hidden, cell, encoder_outputs):
    """Convenience wrapper matching Decoder.forward. In a decode loop, call
    prepare_decoder_weights / prepare_encoder_outputs ONCE and decoder_step
    per token instead (the prep here is the hoistable part)."""
    prep = prepare_decoder_weights(params)
    enc_prep = prepare_encoder_outputs(encoder_outputs,
                                       _round_up(x_ids.shape[0], 8))
    return decoder_step(prep, x_ids, hidden, cell, enc_prep)


# ------------------------------- param init -------------------------------- #

def init_decoder_params(key, vocab_size, embed_dim, hidden_dim, num_layers):
    """f32 parameters in PyTorch layout (Embedding / nn.LSTM / nn.Linear)."""
    params = {}
    key, k_emb = jax.random.split(key)
    params["embedding"] = jax.random.normal(
        k_emb, (vocab_size, embed_dim), jnp.float32)      # nn.Embedding ~ N(0,1)

    stdv = 1.0 / math.sqrt(hidden_dim)
    layers = []
    for layer in range(num_layers):
        in_dim = embed_dim if layer == 0 else hidden_dim
        key, k1, k2, k3, k4 = jax.random.split(key, 5)
        layers.append({
            "w_ih": jax.random.uniform(k1, (4 * hidden_dim, in_dim), jnp.float32,
                                       -stdv, stdv),
            "w_hh": jax.random.uniform(k2, (4 * hidden_dim, hidden_dim),
                                       jnp.float32, -stdv, stdv),
            "b_ih": jax.random.uniform(k3, (4 * hidden_dim,), jnp.float32,
                                       -stdv, stdv),
            "b_hh": jax.random.uniform(k4, (4 * hidden_dim,), jnp.float32,
                                       -stdv, stdv),
        })
    params["lstm"] = layers

    bound = 1.0 / math.sqrt(2 * hidden_dim)
    key, k_fcw, k_fcb = jax.random.split(key, 3)
    params["w_fc"] = jax.random.uniform(
        k_fcw, (vocab_size, 2 * hidden_dim), jnp.float32, -bound, bound)
    params["b_fc"] = jax.random.uniform(
        k_fcb, (vocab_size,), jnp.float32, -bound, bound)
    return params


# ---------------------------- pure-JAX reference --------------------------- #

def _decoder_reference(params, prep, x_ids, hidden, cell, encoder_outputs):
    """Reference using the same prepared bf16 weights (f32 accumulation), so it
    reflects exactly what the kernel is supposed to compute."""
    H = prep["hidden_dim"]
    V = prep["vocab_size"]
    x = jnp.take(params["embedding"], x_ids, axis=0).astype(jnp.bfloat16)
    hs, cs = [], []
    for l, lp in enumerate(prep["layers"]):
        h_prev = hidden[l].astype(jnp.bfloat16)
        gates = [jnp.dot(x, lp["w_ih"][g], preferred_element_type=jnp.float32)
                 + jnp.dot(h_prev, lp["w_hh"][g], preferred_element_type=jnp.float32)
                 + lp["bias"][g] for g in range(4)]
        i = jax.nn.sigmoid(gates[0])
        f = jax.nn.sigmoid(gates[1])
        g = jnp.tanh(gates[2])
        o = jax.nn.sigmoid(gates[3])
        c_new = f * cell[l] + i * g
        h_new = o * jnp.tanh(c_new)
        hs.append(h_new)
        cs.append(c_new)
        x = h_new.astype(jnp.bfloat16)

    q = hs[-1]
    enc = encoder_outputs.astype(jnp.bfloat16).astype(jnp.float32)
    energy = jnp.einsum('bh,bsh->bs', q, enc) / math.sqrt(H)
    attn = jax.nn.softmax(energy, axis=-1)
    ctx = jnp.einsum('bs,bsh->bh', attn, enc)

    pred = (jnp.dot(hs[-1].astype(jnp.bfloat16), prep["w_fc_h"][:, :V],
                    preferred_element_type=jnp.float32)
            + jnp.dot(ctx.astype(jnp.bfloat16), prep["w_fc_c"][:, :V],
                      preferred_element_type=jnp.float32)
            + prep["b_fc"][:, :V])
    return pred[:, None, :], jnp.stack(hs, 0), jnp.stack(cs, 0)


# ----------------------------------- main ----------------------------------- #

if __name__ == "__main__":
    vocab_size, embed_dim, hidden_dim, num_layers = 50, 32, 32, 2
    batch, src_len = 2, 8
    # dropout=0.0 (inference): nn.LSTM inter-layer dropout is a no-op here.

    key = jax.random.PRNGKey(0)
    key, k_params, k_ids, k_h, k_c, k_enc = jax.random.split(key, 6)
    params = init_decoder_params(k_params, vocab_size, embed_dim,
                                 hidden_dim, num_layers)
    x_ids = jax.random.randint(k_ids, (batch,), 0, vocab_size, jnp.int32)
    hidden = jax.random.normal(k_h, (num_layers, batch, hidden_dim), jnp.float32)
    cell = jax.random.normal(k_c, (num_layers, batch, hidden_dim), jnp.float32)
    enc_out = jax.random.normal(k_enc, (batch, src_len, hidden_dim), jnp.float32)

    # Hoisted prep (once per model / per source sequence), then one fused
    # pallas_call per decode step.
    prep = prepare_decoder_weights(params)
    enc_prep = prepare_encoder_outputs(enc_out, _round_up(batch, 8))

    pred, h_out, c_out = jax.block_until_ready(
        decoder_step(prep, x_ids, hidden, cell, enc_prep))

    assert pred.shape == (batch, 1, vocab_size)
    assert h_out.shape == (num_layers, batch, hidden_dim)
    assert c_out.shape == (num_layers, batch, hidden_dim)

    ref_pred, ref_h, ref_c = _decoder_reference(params, prep, x_ids, hidden,
                                                cell, enc_out)
    # Tolerance covers the approximate (EUP) softmax reciprocal.
    for a, b in ((pred, ref_pred), (h_out, ref_h), (c_out, ref_c)):
        assert jnp.allclose(a, b, rtol=1e-2, atol=1e-2), "mismatch vs reference"

    print("KERNEL_OK")
</pallas_src>

<mosaic_0001>
module attributes {stable_mosaic.version = 11 : i64} {
  func.func @kernel(%arg0: i32, %arg1: memref<8x32xbf16, #tpu.memory_space<vmem>>, %arg2: memref<2x8x32xf32, #tpu.memory_space<vmem>>, %arg3: memref<2x8x32xf32, #tpu.memory_space<vmem>>, %arg4: memref<8x8x32xbf16, #tpu.memory_space<vmem>>, %arg5: memref<4x32x32xbf16, #tpu.memory_space<vmem>>, %arg6: memref<4x32x32xbf16, #tpu.memory_space<vmem>>, %arg7: memref<4x1x32xf32, #tpu.memory_space<vmem>>, %arg8: memref<4x32x32xbf16, #tpu.memory_space<vmem>>, %arg9: memref<4x32x32xbf16, #tpu.memory_space<vmem>>, %arg10: memref<4x1x32xf32, #tpu.memory_space<vmem>>, %arg11: memref<32x128xbf16, #tpu.memory_space<vmem>>, %arg12: memref<32x128xbf16, #tpu.memory_space<vmem>>, %arg13: memref<1x128xf32, #tpu.memory_space<vmem>>, %arg14: memref<8x128xf32, #tpu.memory_space<vmem>>, %arg15: memref<2x8x32xf32, #tpu.memory_space<vmem>>, %arg16: memref<2x8x32xf32, #tpu.memory_space<vmem>>, %arg17: memref<8x32xf32, #tpu.memory_space<vmem>>, %arg18: memref<8x32xf32, #tpu.memory_space<vmem>>) attributes {dimension_semantics = [#tpu.dimension_semantics<arbitrary>], iteration_bounds = array<i64: 1>, scalar_prefetch = 0 : i64, scratch_operands = 2 : i64, tpu.core_type = #tpu.core_type<tc>, window_params = [{pipeline_mode = #tpu.pipeline_mode<synchronous>, transform_indices = @transform_0, window_bounds = array<i64: 8, 32>}, {pipeline_mode = #tpu.pipeline_mode<synchronous>, transform_indices = @transform_1, window_bounds = array<i64: 2, 8, 32>}, {pipeline_mode = #tpu.pipeline_mode<synchronous>, transform_indices = @transform_2, window_bounds = array<i64: 2, 8, 32>}, {pipeline_mode = #tpu.pipeline_mode<synchronous>, transform_indices = @transform_3, window_bounds = array<i64: 8, 8, 32>}, {pipeline_mode = #tpu.pipeline_mode<synchronous>, transform_indices = @transform_4, window_bounds = array<i64: 4, 32, 32>}, {pipeline_mode = #tpu.pipeline_mode<synchronous>, transform_indices = @transform_5, window_bounds = array<i64: 4, 32, 32>}, {pipeline_mode = #tpu.pipeline_mode<synchronous>, transform_indices = @transform_6, window_bounds = array<i64: 4, 1, 32>}, {pipeline_mode = #tpu.pipeline_mode<synchronous>, transform_indices = @transform_7, window_bounds = array<i64: 4, 32, 32>}, {pipeline_mode = #tpu.pipeline_mode<synchronous>, transform_indices = @transform_8, window_bounds = array<i64: 4, 32, 32>}, {pipeline_mode = #tpu.pipeline_mode<synchronous>, transform_indices = @transform_9, window_bounds = array<i64: 4, 1, 32>}, {transform_indices = @transform_10, window_bounds = array<i64: 32, 128>}, {transform_indices = @transform_11, window_bounds = array<i64: 32, 128>}, {transform_indices = @transform_12, window_bounds = array<i64: 1, 128>}, {transform_indices = @transform_13, window_bounds = array<i64: 8, 128>}, {pipeline_mode = #tpu.pipeline_mode<synchronous>, transform_indices = @transform_14, window_bounds = array<i64: 2, 8, 32>}, {pipeline_mode = #tpu.pipeline_mode<synchronous>, transform_indices = @transform_15, window_bounds = array<i64: 2, 8, 32>}]} {
    %c0_i32 = arith.constant 0 : i32
    %0 = arith.cmpi eq, %arg0, %c0_i32 : i32
    %1 = arith.extui %0 : i1 to i32
    %c0_i32_0 = arith.constant 0 : i32
    %2 = arith.cmpi ne, %1, %c0_i32_0 : i32
    scf.if %2 {
      %c0_13 = arith.constant 0 : index
      %c0_14 = arith.constant 0 : index
      %16 = vector.load %arg1[%c0_13, %c0_14] : memref<8x32xbf16, #tpu.memory_space<vmem>>, vector<8x32xbf16>
      %c0_15 = arith.constant 0 : index
      %c0_16 = arith.constant 0 : index
      %c0_17 = arith.constant 0 : index
      %17 = vector.load %arg2[%c0_15, %c0_16, %c0_17] : memref<2x8x32xf32, #tpu.memory_space<vmem>>, vector<1x8x32xf32>
      %18 = vector.shape_cast %17 : vector<1x8x32xf32> to vector<8x32xf32>
      %19 = arith.truncf %18 : vector<8x32xf32> to vector<8x32xbf16>
      %c0_18 = arith.constant 0 : index
      %c0_19 = arith.constant 0 : index
      %c0_20 = arith.constant 0 : index
      %20 = vector.load %arg3[%c0_18, %c0_19, %c0_20] : memref<2x8x32xf32, #tpu.memory_space<vmem>>, vector<1x8x32xf32>
      %21 = vector.shape_cast %20 : vector<1x8x32xf32> to vector<8x32xf32>
      %c0_21 = arith.constant 0 : index
      %c0_22 = arith.constant 0 : index
      %c0_23 = arith.constant 0 : index
      %22 = vector.load %arg5[%c0_21, %c0_22, %c0_23] : memref<4x32x32xbf16, #tpu.memory_space<vmem>>, vector<1x32x32xbf16>
      %23 = vector.shape_cast %22 : vector<1x32x32xbf16> to vector<32x32xbf16>
      %cst_24 = arith.constant dense<0.000000e+00> : vector<8x32xf32>
      %24 = tpu.matmul %16, %23, %cst_24 {dimension_numbers = #tpu.dot_dimension_numbers<[1], [0], [0], [1], [0, 0, 1, 1], [], []>} : vector<8x32xbf16>, vector<32x32xbf16>, vector<8x32xf32> -> vector<8x32xf32>
      %c0_25 = arith.constant 0 : index
      %c0_26 = arith.constant 0 : index
      %c0_27 = arith.constant 0 : index
      %25 = vector.load %arg6[%c0_25, %c0_26, %c0_27] : memref<4x32x32xbf16, #tpu.memory_space<vmem>>, vector<1x32x32xbf16>
      %26 = vector.shape_cast %25 : vector<1x32x32xbf16> to vector<32x32xbf16>
      %cst_28 = arith.constant dense<0.000000e+00> : vector<8x32xf32>
      %27 = tpu.matmul %19, %26, %cst_28 {dimension_numbers = #tpu.dot_dimension_numbers<[1], [0], [0], [1], [0, 0, 1, 1], [], []>} : vector<8x32xbf16>, vector<32x32xbf16>, vector<8x32xf32> -> vector<8x32xf32>
      %28 = arith.addf %24, %27 : vector<8x32xf32>
      %c0_29 = arith.constant 0 : index
      %c0_30 = arith.constant 0 : index
      %c0_31 = arith.constant 0 : index
      %29 = vector.load %arg7[%c0_29, %c0_30, %c0_31] : memref<4x1x32xf32, #tpu.memory_space<vmem>>, vector<1x1x32xf32>
      %30 = vector.shape_cast %29 : vector<1x1x32xf32> to vector<1x32xf32>
      %31 = vector.broadcast %30 : vector<1x32xf32> to vector<8x32xf32>
      %32 = arith.addf %28, %31 : vector<8x32xf32>
      %33 = arith.negf %32 : vector<8x32xf32>
      %34 = math.exp %33 : vector<8x32xf32>
      %cst_32 = arith.constant 1.000000e+00 : f32
      %35 = vector.broadcast %cst_32 : f32 to vector<8x32xf32>
      %36 = arith.addf %35, %34 : vector<8x32xf32>
      %37 = arith.divf %35, %36 : vector<8x32xf32>
      %c1 = arith.constant 1 : index
      %c0_33 = arith.constant 0 : index
      %c0_34 = arith.constant 0 : index
      %38 = vector.load %arg5[%c1, %c0_33, %c0_34] : memref<4x32x32xbf16, #tpu.memory_space<vmem>>, vector<1x32x32xbf16>
      %39 = vector.shape_cast %38 : vector<1x32x32xbf16> to vector<32x32xbf16>
      %cst_35 = arith.constant dense<0.000000e+00> : vector<8x32xf32>
      %40 = tpu.matmul %16, %39, %cst_35 {dimension_numbers = #tpu.dot_dimension_numbers<[1], [0], [0], [1], [0, 0, 1, 1], [], []>} : vector<8x32xbf16>, vector<32x32xbf16>, vector<8x32xf32> -> vector<8x32xf32>
      %c1_36 = arith.constant 1 : index
      %c0_37 = arith.constant 0 : index
      %c0_38 = arith.constant 0 : index
      %41 = vector.load %arg6[%c1_36, %c0_37, %c0_38] : memref<4x32x32xbf16, #tpu.memory_space<vmem>>, vector<1x32x32xbf16>
      %42 = vector.shape_cast %41 : vector<1x32x32xbf16> to vector<32x32xbf16>
      %cst_39 = arith.constant dense<0.000000e+00> : vector<8x32xf32>
      %43 = tpu.matmul %19, %42, %cst_39 {dimension_numbers = #tpu.dot_dimension_numbers<[1], [0], [0], [1], [0, 0, 1, 1], [], []>} : vector<8x32xbf16>, vector<32x32xbf16>, vector<8x32xf32> -> vector<8x32xf32>
      %44 = arith.addf %40, %43 : vector<8x32xf32>
      %c1_40 = arith.constant 1 : index
      %c0_41 = arith.constant 0 : index
      %c0_42 = arith.constant 0 : index
      %45 = vector.load %arg7[%c1_40, %c0_41, %c0_42] : memref<4x1x32xf32, #tpu.memory_space<vmem>>, vector<1x1x32xf32>
      %46 = vector.shape_cast %45 : vector<1x1x32xf32> to vector<1x32xf32>
      %47 = vector.broadcast %46 : vector<1x32xf32> to vector<8x32xf32>
      %48 = arith.addf %44, %47 : vector<8x32xf32>
      %49 = arith.negf %48 : vector<8x32xf32>
      %50 = math.exp %49 : vector<8x32xf32>
      %cst_43 = arith.constant 1.000000e+00 : f32
      %51 = vector.broadcast %cst_43 : f32 to vector<8x32xf32>
      %52 = arith.addf %51, %50 : vector<8x32xf32>
      %53 = arith.divf %51, %52 : vector<8x32xf32>
      %c2 = arith.constant 2 : index
      %c0_44 = arith.constant 0 : index
      %c0_45 = arith.constant 0 : index
      %54 = vector.load %arg5[%c2, %c0_44, %c0_45] : memref<4x32x32xbf16, #tpu.memory_space<vmem>>, vector<1x32x32xbf16>
      %55 = vector.shape_cast %54 : vector<1x32x32xbf16> to vector<32x32xbf16>
      %cst_46 = arith.constant dense<0.000000e+00> : vector<8x32xf32>
      %56 = tpu.matmul %16, %55, %cst_46 {dimension_numbers = #tpu.dot_dimension_numbers<[1], [0], [0], [1], [0, 0, 1, 1], [], []>} : vector<8x32xbf16>, vector<32x32xbf16>, vector<8x32xf32> -> vector<8x32xf32>
      %c2_47 = arith.constant 2 : index
      %c0_48 = arith.constant 0 : index
      %c0_49 = arith.constant 0 : index
      %57 = vector.load %arg6[%c2_47, %c0_48, %c0_49] : memref<4x32x32xbf16, #tpu.memory_space<vmem>>, vector<1x32x32xbf16>
      %58 = vector.shape_cast %57 : vector<1x32x32xbf16> to vector<32x32xbf16>
      %cst_50 = arith.constant dense<0.000000e+00> : vector<8x32xf32>
      %59 = tpu.matmul %19, %58, %cst_50 {dimension_numbers = #tpu.dot_dimension_numbers<[1], [0], [0], [1], [0, 0, 1, 1], [], []>} : vector<8x32xbf16>, vector<32x32xbf16>, vector<8x32xf32> -> vector<8x32xf32>
      %60 = arith.addf %56, %59 : vector<8x32xf32>
      %c2_51 = arith.constant 2 : index
      %c0_52 = arith.constant 0 : index
      %c0_53 = arith.constant 0 : index
      %61 = vector.load %arg7[%c2_51, %c0_52, %c0_53] : memref<4x1x32xf32, #tpu.memory_space<vmem>>, vector<1x1x32xf32>
      %62 = vector.shape_cast %61 : vector<1x1x32xf32> to vector<1x32xf32>
      %63 = vector.broadcast %62 : vector<1x32xf32> to vector<8x32xf32>
      %64 = arith.addf %60, %63 : vector<8x32xf32>
      %65 = math.tanh %64 : vector<8x32xf32>
      %c3 = arith.constant 3 : index
      %c0_54 = arith.constant 0 : index
      %c0_55 = arith.constant 0 : index
      %66 = vector.load %arg5[%c3, %c0_54, %c0_55] : memref<4x32x32xbf16, #tpu.memory_space<vmem>>, vector<1x32x32xbf16>
      %67 = vector.shape_cast %66 : vector<1x32x32xbf16> to vector<32x32xbf16>
      %cst_56 = arith.constant dense<0.000000e+00> : vector<8x32xf32>
      %68 = tpu.matmul %16, %67, %cst_56 {dimension_numbers = #tpu.dot_dimension_numbers<[1], [0], [0], [1], [0, 0, 1, 1], [], []>} : vector<8x32xbf16>, vector<32x32xbf16>, vector<8x32xf32> -> vector<8x32xf32>
      %c3_57 = arith.constant 3 : index
      %c0_58 = arith.constant 0 : index
      %c0_59 = arith.constant 0 : index
      %69 = vector.load %arg6[%c3_57, %c0_58, %c0_59] : memref<4x32x32xbf16, #tpu.memory_space<vmem>>, vector<1x32x32xbf16>
      %70 = vector.shape_cast %69 : vector<1x32x32xbf16> to vector<32x32xbf16>
      %cst_60 = arith.constant dense<0.000000e+00> : vector<8x32xf32>
      %71 = tpu.matmul %19, %70, %cst_60 {dimension_numbers = #tpu.dot_dimension_numbers<[1], [0], [0], [1], [0, 0, 1, 1], [], []>} : vector<8x32xbf16>, vector<32x32xbf16>, vector<8x32xf32> -> vector<8x32xf32>
      %72 = arith.addf %68, %71 : vector<8x32xf32>
      %c3_61 = arith.constant 3 : index
      %c0_62 = arith.constant 0 : index
      %c0_63 = arith.constant 0 : index
      %73 = vector.load %arg7[%c3_61, %c0_62, %c0_63] : memref<4x1x32xf32, #tpu.memory_space<vmem>>, vector<1x1x32xf32>
      %74 = vector.shape_cast %73 : vector<1x1x32xf32> to vector<1x32xf32>
      %75 = vector.broadcast %74 : vector<1x32xf32> to vector<8x32xf32>
      %76 = arith.addf %72, %75 : vector<8x32xf32>
      %77 = arith.negf %76 : vector<8x32xf32>
      %78 = math.exp %77 : vector<8x32xf32>
      %cst_64 = arith.constant 1.000000e+00 : f32
      %79 = vector.broadcast %cst_64 : f32 to vector<8x32xf32>
      %80 = arith.addf %79, %78 : vector<8x32xf32>
      %81 = arith.divf %79, %80 : vector<8x32xf32>
      %82 = arith.mulf %53, %21 : vector<8x32xf32>
      %83 = arith.mulf %37, %65 : vector<8x32xf32>
      %84 = arith.addf %82, %83 : vector<8x32xf32>
      %85 = math.tanh %84 : vector<8x32xf32>
      %86 = arith.mulf %81, %85 : vector<8x32xf32>
      %c0_65 = arith.constant 0 : index
      %c0_66 = arith.constant 0 : index
      %c0_67 = arith.constant 0 : index
      %87 = vector.load %arg15[%c0_65, %c0_66, %c0_67] : memref<2x8x32xf32, #tpu.memory_space<vmem>>, vector<1x8x32xf32>
      %88 = vector.shape_cast %87 : vector<1x8x32xf32> to vector<8x32xf32>
      %89 = vector.shape_cast %86 : vector<8x32xf32> to vector<1x8x32xf32>
      tpu.vector_store %arg15[%c0_65, %c0_66, %c0_67], %89 {strides = array<i32>} : memref<2x8x32xf32, #tpu.memory_space<vmem>>, vector<1x8x32xf32>,
      %c0_68 = arith.constant 0 : index
      %c0_69 = arith.constant 0 : index
      %c0_70 = arith.constant 0 : index
      %90 = vector.load %arg16[%c0_68, %c0_69, %c0_70] : memref<2x8x32xf32, #tpu.memory_space<vmem>>, vector<1x8x32xf32>
      %91 = vector.shape_cast %90 : vector<1x8x32xf32> to vector<8x32xf32>
      %92 = vector.shape_cast %84 : vector<8x32xf32> to vector<1x8x32xf32>
      tpu.vector_store %arg16[%c0_68, %c0_69, %c0_70], %92 {strides = array<i32>} : memref<2x8x32xf32, #tpu.memory_space<vmem>>, vector<1x8x32xf32>,
      %93 = arith.truncf %86 : vector<8x32xf32> to vector<8x32xbf16>
      %c1_71 = arith.constant 1 : index
      %c0_72 = arith.constant 0 : index
      %c0_73 = arith.constant 0 : index
      %94 = vector.load %arg2[%c1_71, %c0_72, %c0_73] : memref<2x8x32xf32, #tpu.memory_space<vmem>>, vector<1x8x32xf32>
      %95 = vector.shape_cast %94 : vector<1x8x32xf32> to vector<8x32xf32>
      %96 = arith.truncf %95 : vector<8x32xf32> to vector<8x32xbf16>
      %c1_74 = arith.constant 1 : index
      %c0_75 = arith.constant 0 : index
      %c0_76 = arith.constant 0 : index
      %97 = vector.load %arg3[%c1_74, %c0_75, %c0_76] : memref<2x8x32xf32, #tpu.memory_space<vmem>>, vector<1x8x32xf32>
      %98 = vector.shape_cast %97 : vector<1x8x32xf32> to vector<8x32xf32>
      %c0_77 = arith.constant 0 : index
      %c0_78 = arith.constant 0 : index
      %c0_79 = arith.constant 0 : index
      %99 = vector.load %arg8[%c0_77, %c0_78, %c0_79] : memref<4x32x32xbf16, #tpu.memory_space<vmem>>, vector<1x32x32xbf16>
      %100 = vector.shape_cast %99 : vector<1x32x32xbf16> to vector<32x32xbf16>
      %cst_80 = arith.constant dense<0.000000e+00> : vector<8x32xf32>
      %101 = tpu.matmul %93, %100, %cst_80 {dimension_numbers = #tpu.dot_dimension_numbers<[1], [0], [0], [1], [0, 0, 1, 1], [], []>} : vector<8x32xbf16>, vector<32x32xbf16>, vector<8x32xf32> -> vector<8x32xf32>
      %c0_81 = arith.constant 0 : index
      %c0_82 = arith.constant 0 : index
      %c0_83 = arith.constant 0 : index
      %102 = vector.load %arg9[%c0_81, %c0_82, %c0_83] : memref<4x32x32xbf16, #tpu.memory_space<vmem>>, vector<1x32x32xbf16>
      %103 = vector.shape_cast %102 : vector<1x32x32xbf16> to vector<32x32xbf16>
      %cst_84 = arith.constant dense<0.000000e+00> : vector<8x32xf32>
      %104 = tpu.matmul %96, %103, %cst_84 {dimension_numbers = #tpu.dot_dimension_numbers<[1], [0], [0], [1], [0, 0, 1, 1], [], []>} : vector<8x32xbf16>, vector<32x32xbf16>, vector<8x32xf32> -> vector<8x32xf32>
      %105 = arith.addf %101, %104 : vector<8x32xf32>
      %c0_85 = arith.constant 0 : index
      %c0_86 = arith.constant 0 : index
      %c0_87 = arith.constant 0 : index
      %106 = vector.load %arg10[%c0_85, %c0_86, %c0_87] : memref<4x1x32xf32, #tpu.memory_space<vmem>>, vector<1x1x32xf32>
      %107 = vector.shape_cast %106 : vector<1x1x32xf32> to vector<1x32xf32>
      %108 = vector.broadcast %107 : vector<1x32xf32> to vector<8x32xf32>
      %109 = arith.addf %105, %108 : vector<8x32xf32>
      %110 = arith.negf %109 : vector<8x32xf32>
      %111 = math.exp %110 : vector<8x32xf32>
      %cst_88 = arith.constant 1.000000e+00 : f32
      %112 = vector.broadcast %cst_88 : f32 to vector<8x32xf32>
      %113 = arith.addf %112, %111 : vector<8x32xf32>
      %114 = arith.divf %112, %113 : vector<8x32xf32>
      %c1_89 = arith.constant 1 : index
      %c0_90 = arith.constant 0 : index
      %c0_91 = arith.constant 0 : index
      %115 = vector.load %arg8[%c1_89, %c0_90, %c0_91] : memref<4x32x32xbf16, #tpu.memory_space<vmem>>, vector<1x32x32xbf16>
      %116 = vector.shape_cast %115 : vector<1x32x32xbf16> to vector<32x32xbf16>
      %cst_92 = arith.constant dense<0.000000e+00> : vector<8x32xf32>
      %117 = tpu.matmul %93, %116, %cst_92 {dimension_numbers = #tpu.dot_dimension_numbers<[1], [0], [0], [1], [0, 0, 1, 1], [], []>} : vector<8x32xbf16>, vector<32x32xbf16>, vector<8x32xf32> -> vector<8x32xf32>
      %c1_93 = arith.constant 1 : index
      %c0_94 = arith.constant 0 : index
      %c0_95 = arith.constant 0 : index
      %118 = vector.load %arg9[%c1_93, %c0_94, %c0_95] : memref<4x32x32xbf16, #tpu.memory_space<vmem>>, vector<1x32x32xbf16>
      %119 = vector.shape_cast %118 : vector<1x32x32xbf16> to vector<32x32xbf16>
      %cst_96 = arith.constant dense<0.000000e+00> : vector<8x32xf32>
      %120 = tpu.matmul %96, %119, %cst_96 {dimension_numbers = #tpu.dot_dimension_numbers<[1], [0], [0], [1], [0, 0, 1, 1], [], []>} : vector<8x32xbf16>, vector<32x32xbf16>, vector<8x32xf32> -> vector<8x32xf32>
      %121 = arith.addf %117, %120 : vector<8x32xf32>
      %c1_97 = arith.constant 1 : index
      %c0_98 = arith.constant 0 : index
      %c0_99 = arith.constant 0 : index
      %122 = vector.load %arg10[%c1_97, %c0_98, %c0_99] : memref<4x1x32xf32, #tpu.memory_space<vmem>>, vector<1x1x32xf32>
      %123 = vector.shape_cast %122 : vector<1x1x32xf32> to vector<1x32xf32>
      %124 = vector.broadcast %123 : vector<1x32xf32> to vector<8x32xf32>
      %125 = arith.addf %121, %124 : vector<8x32xf32>
      %126 = arith.negf %125 : vector<8x32xf32>
      %127 = math.exp %126 : vector<8x32xf32>
      %cst_100 = arith.constant 1.000000e+00 : f32
      %128 = vector.broadcast %cst_100 : f32 to vector<8x32xf32>
      %129 = arith.addf %128, %127 : vector<8x32xf32>
      %130 = arith.divf %128, %129 : vector<8x32xf32>
      %c2_101 = arith.constant 2 : index
      %c0_102 = arith.constant 0 : index
      %c0_103 = arith.constant 0 : index
      %131 = vector.load %arg8[%c2_101, %c0_102, %c0_103] : memref<4x32x32xbf16, #tpu.memory_space<vmem>>, vector<1x32x32xbf16>
      %132 = vector.shape_cast %131 : vector<1x32x32xbf16> to vector<32x32xbf16>
      %cst_104 = arith.constant dense<0.000000e+00> : vector<8x32xf32>
      %133 = tpu.matmul %93, %132, %cst_104 {dimension_numbers = #tpu.dot_dimension_numbers<[1], [0], [0], [1], [0, 0, 1, 1], [], []>} : vector<8x32xbf16>, vector<32x32xbf16>, vector<8x32xf32> -> vector<8x32xf32>
      %c2_105 = arith.constant 2 : index
      %c0_106 = arith.constant 0 : index
      %c0_107 = arith.constant 0 : index
      %134 = vector.load %arg9[%c2_105, %c0_106, %c0_107] : memref<4x32x32xbf16, #tpu.memory_space<vmem>>, vector<1x32x32xbf16>
      %135 = vector.shape_cast %134 : vector<1x32x32xbf16> to vector<32x32xbf16>
      %cst_108 = arith.constant dense<0.000000e+00> : vector<8x32xf32>
      %136 = tpu.matmul %96, %135, %cst_108 {dimension_numbers = #tpu.dot_dimension_numbers<[1], [0], [0], [1], [0, 0, 1, 1], [], []>} : vector<8x32xbf16>, vector<32x32xbf16>, vector<8x32xf32> -> vector<8x32xf32>
      %137 = arith.addf %133, %136 : vector<8x32xf32>
      %c2_109 = arith.constant 2 : index
      %c0_110 = arith.constant 0 : index
      %c0_111 = arith.constant 0 : index
      %138 = vector.load %arg10[%c2_109, %c0_110, %c0_111] : memref<4x1x32xf32, #tpu.memory_space<vmem>>, vector<1x1x32xf32>
      %139 = vector.shape_cast %138 : vector<1x1x32xf32> to vector<1x32xf32>
      %140 = vector.broadcast %139 : vector<1x32xf32> to vector<8x32xf32>
      %141 = arith.addf %137, %140 : vector<8x32xf32>
      %142 = math.tanh %141 : vector<8x32xf32>
      %c3_112 = arith.constant 3 : index
      %c0_113 = arith.constant 0 : index
      %c0_114 = arith.constant 0 : index
      %143 = vector.load %arg8[%c3_112, %c0_113, %c0_114] : memref<4x32x32xbf16, #tpu.memory_space<vmem>>, vector<1x32x32xbf16>
      %144 = vector.shape_cast %143 : vector<1x32x32xbf16> to vector<32x32xbf16>
      %cst_115 = arith.constant dense<0.000000e+00> : vector<8x32xf32>
      %145 = tpu.matmul %93, %144, %cst_115 {dimension_numbers = #tpu.dot_dimension_numbers<[1], [0], [0], [1], [0, 0, 1, 1], [], []>} : vector<8x32xbf16>, vector<32x32xbf16>, vector<8x32xf32> -> vector<8x32xf32>
      %c3_116 = arith.constant 3 : index
      %c0_117 = arith.constant 0 : index
      %c0_118 = arith.constant 0 : index
      %146 = vector.load %arg9[%c3_116, %c0_117, %c0_118] : memref<4x32x32xbf16, #tpu.memory_space<vmem>>, vector<1x32x32xbf16>
      %147 = vector.shape_cast %146 : vector<1x32x32xbf16> to vector<32x32xbf16>
      %cst_119 = arith.constant dense<0.000000e+00> : vector<8x32xf32>
      %148 = tpu.matmul %96, %147, %cst_119 {dimension_numbers = #tpu.dot_dimension_numbers<[1], [0], [0], [1], [0, 0, 1, 1], [], []>} : vector<8x32xbf16>, vector<32x32xbf16>, vector<8x32xf32> -> vector<8x32xf32>
      %149 = arith.addf %145, %148 : vector<8x32xf32>
      %c3_120 = arith.constant 3 : index
      %c0_121 = arith.constant 0 : index
      %c0_122 = arith.constant 0 : index
      %150 = vector.load %arg10[%c3_120, %c0_121, %c0_122] : memref<4x1x32xf32, #tpu.memory_space<vmem>>, vector<1x1x32xf32>
      %151 = vector.shape_cast %150 : vector<1x1x32xf32> to vector<1x32xf32>
      %152 = vector.broadcast %151 : vector<1x32xf32> to vector<8x32xf32>
      %153 = arith.addf %149, %152 : vector<8x32xf32>
      %154 = arith.negf %153 : vector<8x32xf32>
      %155 = math.exp %154 : vector<8x32xf32>
      %cst_123 = arith.constant 1.000000e+00 : f32
      %156 = vector.broadcast %cst_123 : f32 to vector<8x32xf32>
      %157 = arith.addf %156, %155 : vector<8x32xf32>
      %158 = arith.divf %156, %157 : vector<8x32xf32>
      %159 = arith.mulf %130, %98 : vector<8x32xf32>
      %160 = arith.mulf %114, %142 : vector<8x32xf32>
      %161 = arith.addf %159, %160 : vector<8x32xf32>
      %162 = math.tanh %161 : vector<8x32xf32>
      %163 = arith.mulf %158, %162 : vector<8x32xf32>
      %c1_124 = arith.constant 1 : index
      %c0_125 = arith.constant 0 : index
      %c0_126 = arith.constant 0 : index
      %164 = vector.load %arg15[%c1_124, %c0_125, %c0_126] : memref<2x8x32xf32, #tpu.memory_space<vmem>>, vector<1x8x32xf32>
      %165 = vector.shape_cast %164 : vector<1x8x32xf32> to vector<8x32xf32>
      %166 = vector.shape_cast %163 : vector<8x32xf32> to vector<1x8x32xf32>
      tpu.vector_store %arg15[%c1_124, %c0_125, %c0_126], %166 {strides = array<i32>} : memref<2x8x32xf32, #tpu.memory_space<vmem>>, vector<1x8x32xf32>,
      %c1_127 = arith.constant 1 : index
      %c0_128 = arith.constant 0 : index
      %c0_129 = arith.constant 0 : index
      %167 = vector.load %arg16[%c1_127, %c0_128, %c0_129] : memref<2x8x32xf32, #tpu.memory_space<vmem>>, vector<1x8x32xf32>
      %168 = vector.shape_cast %167 : vector<1x8x32xf32> to vector<8x32xf32>
      %169 = vector.shape_cast %161 : vector<8x32xf32> to vector<1x8x32xf32>
      tpu.vector_store %arg16[%c1_127, %c0_128, %c0_129], %169 {strides = array<i32>} : memref<2x8x32xf32, #tpu.memory_space<vmem>>, vector<1x8x32xf32>,
      %c0_130 = arith.constant 0 : index
      %c0_131 = arith.constant 0 : index
      %170 = vector.load %arg17[%c0_130, %c0_131] : memref<8x32xf32, #tpu.memory_space<vmem>>, vector<8x32xf32>
      tpu.vector_store %arg17[%c0_130, %c0_131], %163 {strides = array<i32>} : memref<8x32xf32, #tpu.memory_space<vmem>>, vector<8x32xf32>,
      %c0_132 = arith.constant 0 : index
      %c0_133 = arith.constant 0 : index
      %c0_134 = arith.constant 0 : index
      %171 = vector.load %arg4[%c0_132, %c0_133, %c0_134] : memref<8x8x32xbf16, #tpu.memory_space<vmem>>, vector<8x8x32xbf16>
      %172 = arith.extf %171 : vector<8x8x32xbf16> to vector<8x8x32xf32>
      %cst_135 = arith.constant 0.176776692 : f32
      %173 = vector.broadcast %cst_135 : f32 to vector<8x32xf32>
      %174 = arith.mulf %163, %173 : vector<8x32xf32>
      %175 = vector.shape_cast %174 : vector<8x32xf32> to vector<8x1x32xf32>
      %176 = vector.broadcast %175 : vector<8x1x32xf32> to vector<8x8x32xf32>
      %177 = arith.mulf %176, %172 : vector<8x8x32xf32>
      %cst_136 = arith.constant dense<0.000000e+00> : vector<8x8xf32>
      %178 = vector.multi_reduction <add>, %177, %cst_136 [2] : vector<8x8x32xf32> to vector<8x8xf32>
      %cst_137 = arith.constant dense<0xFF800000> : vector<8xf32>
      %179 = vector.multi_reduction <maximumf>, %178, %cst_137 [1] : vector<8x8xf32> to vector<8xf32>
      %180 = vector.shape_cast %179 : vector<8xf32> to vector<8x1xf32>
      %181 = vector.broadcast %180 : vector<8x1xf32> to vector<8x8xf32>
      %182 = arith.subf %178, %181 : vector<8x8xf32>
      %183 = math.exp %182 : vector<8x8xf32>
      %cst_138 = arith.constant dense<0.000000e+00> : vector<8xf32>
      %184 = vector.multi_reduction <add>, %183, %cst_138 [1] : vector<8x8xf32> to vector<8xf32>
      %185 = vector.shape_cast %184 : vector<8xf32> to vector<8x1xf32>
      %186 = tpu.reciprocal %185 {approx = true} : vector<8x1xf32> -> vector<8x1xf32>
      %187 = vector.broadcast %186 : vector<8x1xf32> to vector<8x8xf32>
      %188 = arith.mulf %183, %187 : vector<8x8xf32>
      %189 = vector.shape_cast %188 : vector<8x8xf32> to vector<8x8x1xf32>
      %190 = vector.broadcast %189 : vector<8x8x1xf32> to vector<8x8x32xf32>
      %191 = arith.mulf %190, %172 : vector<8x8x32xf32>
      %cst_139 = arith.constant dense<0.000000e+00> : vector<8x32xf32>
      %192 = vector.multi_reduction <add>, %191, %cst_139 [1] : vector<8x8x32xf32> to vector<8x32xf32>
      %c0_140 = arith.constant 0 : index
      %c0_141 = arith.constant 0 : index
      %193 = vector.load %arg18[%c0_140, %c0_141] : memref<8x32xf32, #tpu.memory_space<vmem>>, vector<8x32xf32>
      tpu.vector_store %arg18[%c0_140, %c0_141], %192 {strides = array<i32>} : memref<8x32xf32, #tpu.memory_space<vmem>>, vector<8x32xf32>,
    } else {
    }
    %c0 = arith.constant 0 : index
    %c0_1 = arith.constant 0 : index
    %3 = vector.load %arg17[%c0, %c0_1] : memref<8x32xf32, #tpu.memory_space<vmem>>, vector<8x32xf32>
    %4 = arith.truncf %3 : vector<8x32xf32> to vector<8x32xbf16>
    %c0_2 = arith.constant 0 : index
    %c0_3 = arith.constant 0 : index
    %5 = vector.load %arg11[%c0_2, %c0_3] : memref<32x128xbf16, #tpu.memory_space<vmem>>, vector<32x128xbf16>
    %cst = arith.constant dense<0.000000e+00> : vector<8x128xf32>
    %6 = tpu.matmul %4, %5, %cst {dimension_numbers = #tpu.dot_dimension_numbers<[1], [0], [0], [1], [0, 0, 1, 1], [], []>} : vector<8x32xbf16>, vector<32x128xbf16>, vector<8x128xf32> -> vector<8x128xf32>
    %c0_4 = arith.constant 0 : index
    %c0_5 = arith.constant 0 : index
    %7 = vector.load %arg18[%c0_4, %c0_5] : memref<8x32xf32, #tpu.memory_space<vmem>>, vector<8x32xf32>
    %8 = arith.truncf %7 : vector<8x32xf32> to vector<8x32xbf16>
    %c0_6 = arith.constant 0 : index
    %c0_7 = arith.constant 0 : index
    %9 = vector.load %arg12[%c0_6, %c0_7] : memref<32x128xbf16, #tpu.memory_space<vmem>>, vector<32x128xbf16>
    %cst_8 = arith.constant dense<0.000000e+00> : vector<8x128xf32>
    %10 = tpu.matmul %8, %9, %cst_8 {dimension_numbers = #tpu.dot_dimension_numbers<[1], [0], [0], [1], [0, 0, 1, 1], [], []>} : vector<8x32xbf16>, vector<32x128xbf16>, vector<8x128xf32> -> vector<8x128xf32>
    %11 = arith.addf %6, %10 : vector<8x128xf32>
    %c0_9 = arith.constant 0 : index
    %c0_10 = arith.constant 0 : index
    %12 = vector.load %arg13[%c0_9, %c0_10] : memref<1x128xf32, #tpu.memory_space<vmem>>, vector<1x128xf32>
    %13 = vector.broadcast %12 : vector<1x128xf32> to vector<8x128xf32>
    %14 = arith.addf %11, %13 : vector<8x128xf32>
    %c0_11 = arith.constant 0 : index
    %c0_12 = arith.constant 0 : index
    %15 = vector.load %arg14[%c0_11, %c0_12] : memref<8x128xf32, #tpu.memory_space<vmem>>, vector<8x128xf32>
    tpu.vector_store %arg14[%c0_11, %c0_12], %14 {strides = array<i32>} : memref<8x128xf32, #tpu.memory_space<vmem>>, vector<8x128xf32>,
    return
  }
  func.func @transform_0(%arg0: i32) -> (i32, i32) {
    %c0_i32 = arith.constant 0 : i32
    %c0_i32_0 = arith.constant 0 : i32
    %c0_i32_1 = arith.constant 0 : i32
    return %c0_i32, %c0_i32_0 : i32, i32
  }
  func.func @transform_1(%arg0: i32) -> (i32, i32, i32) {
    %c0_i32 = arith.constant 0 : i32
    %c0_i32_0 = arith.constant 0 : i32
    %c0_i32_1 = arith.constant 0 : i32
    %c0_i32_2 = arith.constant 0 : i32
    return %c0_i32, %c0_i32_0, %c0_i32_1 : i32, i32, i32
  }
  func.func @transform_2(%arg0: i32) -> (i32, i32, i32) {
    %c0_i32 = arith.constant 0 : i32
    %c0_i32_0 = arith.constant 0 : i32
    %c0_i32_1 = arith.constant 0 : i32
    %c0_i32_2 = arith.constant 0 : i32
    return %c0_i32, %c0_i32_0, %c0_i32_1 : i32, i32, i32
  }
  func.func @transform_3(%arg0: i32) -> (i32, i32, i32) {
    %c0_i32 = arith.constant 0 : i32
    %c0_i32_0 = arith.constant 0 : i32
    %c0_i32_1 = arith.constant 0 : i32
    %c0_i32_2 = arith.constant 0 : i32
    return %c0_i32, %c0_i32_0, %c0_i32_1 : i32, i32, i32
  }
  func.func @transform_4(%arg0: i32) -> (i32, i32, i32) {
    %c0_i32 = arith.constant 0 : i32
    %c0_i32_0 = arith.constant 0 : i32
    %c0_i32_1 = arith.constant 0 : i32
    %c0_i32_2 = arith.constant 0 : i32
    return %c0_i32, %c0_i32_0, %c0_i32_1 : i32, i32, i32
  }
  func.func @transform_5(%arg0: i32) -> (i32, i32, i32) {
    %c0_i32 = arith.constant 0 : i32
    %c0_i32_0 = arith.constant 0 : i32
    %c0_i32_1 = arith.constant 0 : i32
    %c0_i32_2 = arith.constant 0 : i32
    return %c0_i32, %c0_i32_0, %c0_i32_1 : i32, i32, i32
  }
  func.func @transform_6(%arg0: i32) -> (i32, i32, i32) {
    %c0_i32 = arith.constant 0 : i32
    %c0_i32_0 = arith.constant 0 : i32
    %c0_i32_1 = arith.constant 0 : i32
    %c0_i32_2 = arith.constant 0 : i32
    return %c0_i32, %c0_i32_0, %c0_i32_1 : i32, i32, i32
  }
  func.func @transform_7(%arg0: i32) -> (i32, i32, i32) {
    %c0_i32 = arith.constant 0 : i32
    %c0_i32_0 = arith.constant 0 : i32
    %c0_i32_1 = arith.constant 0 : i32
    %c0_i32_2 = arith.constant 0 : i32
    return %c0_i32, %c0_i32_0, %c0_i32_1 : i32, i32, i32
  }
  func.func @transform_8(%arg0: i32) -> (i32, i32, i32) {
    %c0_i32 = arith.constant 0 : i32
    %c0_i32_0 = arith.constant 0 : i32
    %c0_i32_1 = arith.constant 0 : i32
    %c0_i32_2 = arith.constant 0 : i32
    return %c0_i32, %c0_i32_0, %c0_i32_1 : i32, i32, i32
  }
  func.func @transform_9(%arg0: i32) -> (i32, i32, i32) {
    %c0_i32 = arith.constant 0 : i32
    %c0_i32_0 = arith.constant 0 : i32
    %c0_i32_1 = arith.constant 0 : i32
    %c0_i32_2 = arith.constant 0 : i32
    return %c0_i32, %c0_i32_0, %c0_i32_1 : i32, i32, i32
  }
  func.func @transform_10(%arg0: i32) -> (i32, i32) {
    %c0_i32 = arith.constant 0 : i32
    %c0_i32_0 = arith.constant 0 : i32
    return %c0_i32, %arg0 : i32, i32
  }
  func.func @transform_11(%arg0: i32) -> (i32, i32) {
    %c0_i32 = arith.constant 0 : i32
    %c0_i32_0 = arith.constant 0 : i32
    return %c0_i32, %arg0 : i32, i32
  }
  func.func @transform_12(%arg0: i32) -> (i32, i32) {
    %c0_i32 = arith.constant 0 : i32
    %c0_i32_0 = arith.constant 0 : i32
    return %c0_i32, %arg0 : i32, i32
  }
  func.func @transform_13(%arg0: i32) -> (i32, i32) {
    %c0_i32 = arith.constant 0 : i32
    %c0_i32_0 = arith.constant 0 : i32
    return %c0_i32, %arg0 : i32, i32
  }
  func.func @transform_14(%arg0: i32) -> (i32, i32, i32) {
    %c0_i32 = arith.constant 0 : i32
    %c0_i32_0 = arith.constant 0 : i32
    %c0_i32_1 = arith.constant 0 : i32
    %c0_i32_2 = arith.constant 0 : i32
    return %c0_i32, %c0_i32_0, %c0_i32_1 : i32, i32, i32
  }
  func.func @transform_15(%arg0: i32) -> (i32, i32, i32) {
    %c0_i32 = arith.constant 0 : i32
    %c0_i32_0 = arith.constant 0 : i32
    %c0_i32_1 = arith.constant 0 : i32
    %c0_i32_2 = arith.constant 0 : i32
    return %c0_i32, %c0_i32_0, %c0_i32_1 : i32, i32, i32
  }
}

</mosaic_0001>

<bundles_post_ra>
// kernel: tpu_custom_call.1
= control target key start
LH: loop header
LB: loop body
LE: loop exit
PB: predicated region body
PF: predicated region fallthrough
CT: control target
= control target key end

     0   :  { %21 = vsyncpa [#allocation5], 0  ;;  %s2366_s0 = inlined_call_operand.vmem [shape: bf16[8,32], index: 0, kind: input, shape index: {}]   ;;  %s2367_s1 = inlined_call_operand.hbm [shape: f32[2,8,32], index: 1, kind: input, shape index: {}, may-alias: {1,14}]   ;;  %s2368_s2 = inlined_call_operand.hbm [shape: f32[2,8,32], index: 2, kind: input, shape index: {}, may-alias: {2,15}]   ;;  %s2369_s3 = inlined_call_operand.vmem [shape: bf16[8,8,32], index: 3, kind: input, shape index: {}]   ;;  %s2370_s4 = inlined_call_operand.hbm [shape: bf16[4,32,32], index: 4, kind: input, shape index: {}]   ;;  %s2371_s5 = inlined_call_operand.hbm [shape: bf16[4,32,32], index: 5, kind: input, shape index: {}]   ;;  %s2372_s6 = inlined_call_operand.hbm [shape: f32[4,1,32], index: 6, kind: input, shape index: {}]   ;;  %s2373_s7 = inlined_call_operand.hbm [shape: bf16[4,32,32], index: 7, kind: input, shape index: {}]   ;;  %s2374_s8 = inlined_call_operand.hbm [shape: bf16[4,32,32], index: 8, kind: input, shape index: {}]   ;;  %s2375_s9 = inlined_call_operand.hbm [shape: f32[4,1,32], index: 9, kind: input, shape index: {}]   ;;  %s2376_s10 = inlined_call_operand.vmem [shape: bf16[32,128], index: 10, kind: input, shape index: {}]   ;;  %s2377_s11 = inlined_call_operand.hbm [shape: bf16[32,128], index: 11, kind: input, shape index: {}]   ;;  %s2378_s12 = inlined_call_operand.hbm [shape: f32[1,128], index: 12, kind: input, shape index: {}]   ;;  %s2379_s13 = inlined_call_operand.hbm [shape: f32[8,128], index: 13, kind: output, shape index: {0}]   ;;  %s2380_s14 = inlined_call_operand.hbm [shape: f32[2,8,32], index: 14, kind: output, shape index: {1}, may-alias: {1,14}]   ;;  %s2381_s15 = inlined_call_operand.hbm [shape: f32[2,8,32], index: 15, kind: output, shape index: {2}, may-alias: {2,15}]  }
   0x1   :  { %22 = vsyncpa [#allocation8], 0 }
   0x2   :  { %23 = vsyncpa [#allocation11], 0 }
   0x3   :  { %24 = vsyncpa [#allocation14], 0 }
   0x4   :  { %25 = vsyncpa [#allocation17], 0 }
   0x5   :  { %26 = vsyncpa [#allocation20], 0 }
   0x6   :  { %27 = vsyncpa [#allocation6], 0 }
   0x7   :  { %28 = vsyncpa [#allocation23], 0  ;;  %s48_s20 = sshll.u32 %s2368_s2, 4  ;;  %s2000_s21 = smov [#allocation7]   ;;  %s49_s20 = int_to_ptr.hbm [resolvable:$true] %s48_s20 }
   0x8   :  { %s50_s22 = sshll.u32 %s2000_s21, 4  ;;  %s2001_s23 = smov 128   ;;  %s51_s22 = int_to_ptr.vmem [resolvable:$true] %s50_s22 }
   0x9   :  { %s2002_s24 = smov 8   ;;  %s76_s27 = sshll.u32 %s2371_s5, 4  ;;  %s77_s27 = int_to_ptr.hbm [resolvable:$true] %s76_s27 }
   0xa   :  { %56 = dma.hbm_to_vmem [thread:$0]  %s49_s20, 256, %s51_s22, [#allocation8], %s2001_s23, %s2001_s23, %s2002_s24  }
   0xb   :  { %s2003_s28 = smov [#allocation10]   ;;  %s102_s2 = sshll.u32 %s2373_s7, 4  ;;  %s103_s2 = int_to_ptr.hbm [resolvable:$true] %s102_s2 }
   0xc   :  { %s78_s29 = sshll.u32 %s2003_s28, 4  ;;  %s2004_s17 = smov 64   ;;  %s79_s29 = int_to_ptr.vmem [resolvable:$true] %s78_s29 }
   0xd   :  { %s2005_s18 = smov 4   ;;  %s2006_s19 = smov [#allocation13]  }
   0xe   :  { %84 = dma.hbm_to_vmem [thread:$0]  %s77_s27, 1024, %s79_s29, [#allocation11], %s2004_s17, %s2004_s17, %s2005_s18  }
   0xf   :  { %s104_s20 = sshll.u32 %s2006_s19, 4  ;;  %s128_s22 = sshll.u32 %s2375_s9, 4  ;;  %s105_s20 = int_to_ptr.vmem [resolvable:$true] %s104_s20  ;;  %s129_s22 = int_to_ptr.hbm [resolvable:$true] %s128_s22 }
  0x10   :  { %110 = dma.hbm_to_vmem [thread:$0]  %s103_s2, 1024, %s105_s20, [#allocation14], %s2004_s17, %s2004_s17, %s2005_s18  }
  0x11   :  { %s2007_s7 = smov [#allocation16]   ;;  %s35_s30 = sshll.u32 %s2367_s1, 4  ;;  %s36_s30 = int_to_ptr.hbm [resolvable:$true] %s35_s30 }
  0x12   :  { %s130_s25 = sshll.u32 %s2007_s7, 4  ;;  %s2008_s27 = smov 16   ;;  %s131_s25 = int_to_ptr.vmem [resolvable:$true] %s130_s25 }
  0x13   :  { %s2009_s29 = smov 1   ;;  %s63_s9 = sshll.u32 %s2370_s4, 4  ;;  %s64_s9 = int_to_ptr.hbm [resolvable:$true] %s63_s9 }
  0x14   :  { %136 = dma.hbm_to_vmem [thread:$0]  %s129_s22, 64, %s131_s25, [#allocation17], %s2008_s27, %s2008_s27, %s2009_s29  }
  0x15   :  { %s2010_s21 = smov [#allocation4]   ;;  %s2011_s2 = smov [#allocation9]  }
  0x16   :  { %s37_s5 = sshll.u32 %s2010_s21, 4  ;;  %s65_s20 = sshll.u32 %s2011_s2, 4  ;;  %s38_s5 = int_to_ptr.vmem [resolvable:$true] %s37_s5  ;;  %s66_s20 = int_to_ptr.vmem [resolvable:$true] %s65_s20 }
  0x17   :  { %43 = dma.hbm_to_vmem [thread:$0]  %s36_s30, 256, %s38_s5, [#allocation5], %s2001_s23, %s2001_s23, %s2002_s24  }
  0x18   :  { %s89_s26 = sshll.u32 %s2372_s6, 4  ;;  %s115_s25 = sshll.u32 %s2374_s8, 4  ;;  %s90_s26 = int_to_ptr.hbm [resolvable:$true] %s89_s26  ;;  %s116_s25 = int_to_ptr.hbm [resolvable:$true] %s115_s25 }
  0x19   :  { %71 = dma.hbm_to_vmem [thread:$0]  %s64_s9, 1024, %s66_s20, [#allocation8], %s2004_s17, %s2004_s17, %s2005_s18  }
  0x1a   :  { %s2012_s28 = smov [#allocation12]   ;;  %s2013_s30 = smov [#allocation15]  }
  0x1b   :  { %s91_s16 = sshll.u32 %s2012_s28, 4  ;;  %s117_s19 = sshll.u32 %s2013_s30, 4  ;;  %s92_s16 = int_to_ptr.vmem [resolvable:$true] %s91_s16  ;;  %s118_s19 = int_to_ptr.vmem [resolvable:$true] %s117_s19 }
  0x1c   :  { %97 = dma.hbm_to_vmem [thread:$0]  %s90_s26, 64, %s92_s16, [#allocation11], %s2008_s27, %s2008_s27, %s2009_s29  }
  0x1d   :  { %s143_s6 = sshll.u32 %s2377_s11, 4  ;;  %s157_s8 = sshll.u32 %s2378_s12, 4  ;;  %s144_s6 = int_to_ptr.hbm [resolvable:$true] %s143_s6  ;;  %s158_s8 = int_to_ptr.hbm [resolvable:$true] %s157_s8 }
  0x1e   :  { %123 = dma.hbm_to_vmem [thread:$0]  %s116_s25, 1024, %s118_s19, [#allocation14], %s2004_s17, %s2004_s17, %s2005_s18  }
  0x1f   :  { %s2014_s20 = smov [#allocation18]   ;;  %s2015_s27 = smov [#allocation19]  }
  0x20   :  { %s145_s1 = sshll.u32 %s2014_s20, 4  ;;  %s159_s11 = sshll.u32 %s2015_s27, 4  ;;  %s146_s1 = int_to_ptr.vmem [resolvable:$true] %s145_s1  ;;  %s160_s11 = int_to_ptr.vmem [resolvable:$true] %s159_s11 }
  0x21   :  { %151 = dma.hbm_to_vmem [thread:$0]  %s144_s6, 256, %s146_s1, [#allocation17], %s2004_s17, %s2004_s17, %s2005_s18  }
  0x22   :  { %162 = dma.hbm_to_vmem [thread:$0]  %s158_s8, 16, %s160_s11, [#allocation20]  }
  0x23   :  { %1984 = dma.done.wait [#allocation5], 256  }
  0x24   :  { %1985 = vsyncadd [#allocation5], 4294967040 }
  0x25   :  { %1986 = dma.done.wait [#allocation8], 1280  }
  0x26   :  { %1987 = vsyncadd [#allocation8], 4294966016 }
  0x27   :  { %1988 = dma.done.wait [#allocation11], 1088  }
  0x28   :  { %1989 = vsyncadd [#allocation11], 4294966208 }
  0x29   :  { %1990 = dma.done.wait [#allocation14], 2048  }
  0x2a   :  { %1991 = vsyncadd [#allocation14], 4294965248 }
  0x2b   :  { %1992 = dma.done.wait [#allocation17], 320  }
  0x2c   :  { %1993 = vsyncadd [#allocation17], 4294966976 }
  0x2d   :  { %1994 = dma.done.wait [#allocation20], 16  }
  0x2e   :  { %1995 = vsyncadd [#allocation20], 4294967280  ;;  %v1538_v0 = vld [vmem:[#allocation10 + $0x8] sm:$0xff]  ;;  %v1542_v2 = vld [vmem:[#allocation10 + $0x18] sm:$0xff]  ;;  %vm232_vm0 = vcmask 261120   ;;  %s1327_s21 = sshll.u32 %s2380_s14, 4  ;;  %s1328_s21 = int_to_ptr.hbm [resolvable:$true] %s1327_s21 }
  0x2f   :  { %v1536_v1 = vld [vmem:[#allocation9 + $0x8] sm:$0xff]  ;;  %v1540_v3 = vld [vmem:[#allocation9 + $0x18] sm:$0xff]  ;;  %242 = vmatpush.bf16.msra.mxu0 %v1538_v0  ;;  %v1537_v4 = vld [vmem:[#allocation10] sm:$0xff]  ;;  %329 = vmatpush.bf16.msra.mxu2 %v1542_v2  ;;  %s2017_s5 = smov [#allocation22]   ;;  %s2018_s9 = smov [#allocation24]  }
  0x30   :  { %270 = vmatpush.bf16.msra.mxu1 %v1536_v1  ;;  %v1535_v5 = vld [vmem:[#allocation9] sm:$0xff]  ;;  %354 = vmatpush.bf16.msra.mxu3 %v1540_v3  ;;  %v1541_v7 = vld [vmem:[#allocation10 + $0x10] sm:$0xff]  ;;  %v1550_v9 = vld [vmem:[#allocation10 + $0x38] sm:$0xff]  ;;  %s1325_s6 = sshll.u32 %s2017_s5, 4  ;;  %s1338_s2 = sshll.u32 %s2018_s9, 4  ;;  %s1326_s6 = int_to_ptr.vmem [resolvable:$true] %s1325_s6  ;;  %s1339_s2 = int_to_ptr.vmem [resolvable:$true] %s1338_s2 }
  0x31   :  { %v209_v6 = vld [vmem:[#allocation4] sm:$0xff]  ;;  %v1539_v8 = vld [vmem:[#allocation9 + $0x10] sm:$0xff]  ;;  %v1548_v10 = vld [vmem:[#allocation9 + $0x38] sm:$0xff]  ;;  %s1340_s1 = sshll.u32 %s2381_s15, 4  ;;  %s2019_s14 = smov [#allocation21]   ;;  %s1341_s1 = int_to_ptr.hbm [resolvable:$true] %s1340_s1 }
  0x32   :  { %v210_v11 = vpack.c.bf16 %v209_v6, %v209_v6  ;;  %v208_v12 = vld [vmem:[%s2366_s0] sm:$0xf]  ;;  %v1546_v13 = vld [vmem:[#allocation10 + $0x28] sm:$0xff]  ;;  %v1545_v17 = vld [vmem:[#allocation10 + $0x20] sm:$0xff]  ;;  %s1315_s27 = sshll.u32 %s2019_s14, 4  ;;  %s1317_s17 = sshll.u32 %s2379_s13, 4  ;;  %s1316_s27 = int_to_ptr.vmem [resolvable:$true] %s1315_s27  ;;  %s1318_s17 = int_to_ptr.hbm [resolvable:$true] %s1317_s17 }
  0x33   :  { %v1544_v14 = vld [vmem:[#allocation9 + $0x28] sm:$0xff]  ;;  %243 = vmatpush.bf16.msra.mxu0 %v1537_v4  ;;  %v1549_v15 = vld [vmem:[#allocation10 + $0x30] sm:$0xff]  ;;  %330 = vmatpush.bf16.msra.mxu2 %v1541_v7  ;;  %v1543_v18 = vld [vmem:[#allocation9 + $0x20] sm:$0xff] }
  0x34   :  { %271 = vmatpush.bf16.msra.mxu1 %v1535_v5  ;;  %v1547_v16 = vld [vmem:[#allocation9 + $0x30] sm:$0xff]  ;;  %355 = vmatpush.bf16.msra.mxu3 %v1539_v8  ;;  %v1613_v19 = vld [vmem:[#allocation12] ss:$0 sm:$0xff]  ;;  %v1614_v25 = vld [vmem:[#allocation12 + $0x1] ss:$0 sm:$0xff] }
  0x35   :  { %v1558_v33 = vld [vmem:[#allocation15 + $0x18] sm:$0xff]  ;;  %v1557_v40 = vld [vmem:[#allocation15 + $0x10] sm:$0xff]  ;;  %v547_v42 = vld [vmem:[#allocation4 + $0x8] sm:$0xff] }
  0x36   :  { %1375 = vmatmul.msk.bf16.vlgmr.msra.gmra.mxu0 %vm232_vm0, %v210_v11  ;;  %1394 = vmatmul.msk.bf16.vlgmr.msra.gmra.mxu2 %vm232_vm0, %v210_v11  ;;  %v1556_v41 = vld [vmem:[#allocation13 + $0x18] sm:$0xff]  ;;  %v2165_v43 = vpack.c.bf16 %v547_v42, %v547_v42  ;;  %v1554_v44 = vld [vmem:[#allocation15 + $0x8] sm:$0xff]  ;;  %v1555_v47 = vld [vmem:[#allocation13 + $0x10] sm:$0xff] }
  0x37   :  { %481 = vmatpush.bf16.msrb.mxu2 %v1550_v9  ;;  %1384 = vmatmul.msk.bf16.vlgmr.msra.gmra.mxu1 %vm232_vm0, %v208_v12  ;;  %v1552_v45 = vld [vmem:[#allocation13 + $0x8] sm:$0xff]  ;;  %v1553_v49 = vld [vmem:[#allocation15] sm:$0xff]  ;;  %v1616_v51 = vld [vmem:[#allocation12 + $0x3] ss:$0 sm:$0xff] }
  0x38   :  { %506 = vmatpush.bf16.msrb.mxu3 %v1548_v10  ;;  %414 = vmatpush.bf16.msrb.mxu0 %v1546_v13  ;;  %v1551_v52 = vld [vmem:[#allocation13] sm:$0xff]  ;;  %v1615_v55 = vld [vmem:[#allocation12 + $0x2] ss:$0 sm:$0xff]  ;;  %v1562_v6 = vld [vmem:[#allocation15 + $0x28] sm:$0xff] }
  0x39   :  { %1403 = vmatmul.msk.bf16.vlgmr.msra.gmra.mxu3 %vm232_vm0, %v208_v12  ;;  %439 = vmatpush.bf16.msrb.mxu1 %v1544_v14  ;;  %v1566_v2 = vld [vmem:[#allocation15 + $0x38] sm:$0xff]  ;;  %v1560_v7 = vld [vmem:[#allocation13 + $0x28] sm:$0xff]  ;;  %v1565_v10 = vld [vmem:[#allocation15 + $0x30] sm:$0xff] }
  0x3a   :  { %v1564_v3 = vld [vmem:[#allocation13 + $0x38] sm:$0xff]  ;;  %v1561_v14 = vld [vmem:[#allocation15 + $0x20] sm:$0xff] }
  0x3b   :  { %482 = vmatpush.bf16.msrb.mxu2 %v1549_v15  ;;  %v1559_v15 = vld [vmem:[#allocation13 + $0x20] sm:$0xff] }
  0x3c   :  { %507 = vmatpush.bf16.msrb.mxu3 %v1547_v16  ;;  %415 = vmatpush.bf16.msrb.mxu0 %v1545_v17 }
  0x3d   :  { %440 = vmatpush.bf16.msrb.mxu1 %v1543_v18 }
  0x3f   :  { %667 = vmatpush.bf16.msra.mxu2 %v1558_v33 }
  0x40   :  { %692 = vmatpush.bf16.msra.mxu3 %v1556_v41  ;;  %580 = vmatpush.bf16.msra.mxu0 %v1554_v44 }
  0x41   :  { %608 = vmatpush.bf16.msra.mxu1 %v1552_v45 }
  0x43   :  { %668 = vmatpush.bf16.msra.mxu2 %v1557_v40 }
  0x44   :  { %693 = vmatpush.bf16.msra.mxu3 %v1555_v47  ;;  %581 = vmatpush.bf16.msra.mxu0 %v1553_v49 }
  0x45   :  { %609 = vmatpush.bf16.msra.mxu1 %v1551_v52 }
  0x46   :  { %1413 = vmatmul.msk.bf16.vlgmr.msrb.gmra.mxu0 %vm232_vm0, %v210_v11  ;;  %1431 = vmatmul.msk.bf16.vlgmr.msrb.gmra.mxu2 %vm232_vm0, %v210_v11  ;;  %v1563_v11 = vld [vmem:[#allocation13 + $0x30] sm:$0xff] }
  0x47   :  { %1422 = vmatmul.msk.bf16.vlgmr.msrb.gmra.mxu1 %vm232_vm0, %v208_v12  ;;  %819 = vmatpush.bf16.msrb.mxu2 %v1566_v2 }
  0x48   :  { %752 = vmatpush.bf16.msrb.mxu0 %v1562_v6 }
  0x49   :  { %1440 = vmatmul.msk.bf16.vlgmr.msrb.gmra.mxu3 %vm232_vm0, %v208_v12  ;;  %777 = vmatpush.bf16.msrb.mxu1 %v1560_v7 }
  0x4a   :  { %844 = vmatpush.bf16.msrb.mxu3 %v1564_v3 }
  0x4b   :  { %820 = vmatpush.bf16.msrb.mxu2 %v1565_v10  ;;  %v1620_v10 = vld [vmem:[#allocation16 + $0x3] ss:$0 sm:$0xff] }
  0x4c   :  { %753 = vmatpush.bf16.msrb.mxu0 %v1561_v14 }
  0x4d   :  { %778 = vmatpush.bf16.msrb.mxu1 %v1559_v15 }
  0x4e   :  { %845 = vmatpush.bf16.msrb.mxu3 %v1563_v11 }
  0x56   :  { %1469 = vmatmul.msk.bf16.vlgmr.msra.gmra.mxu2 %vm232_vm0, %v2165_v43  ;;  %1450 = vmatmul.msk.bf16.vlgmr.msra.gmra.mxu0 %vm232_vm0, %v2165_v43 }
  0x66   :  { %1506 = vmatmul.msk.bf16.vlgmr.msrb.gmra.mxu2 %vm232_vm0, %v2165_v43  ;;  %1488 = vmatmul.msk.bf16.vlgmr.msrb.gmra.mxu0 %vm232_vm0, %v2165_v43 }
  0xb3   :  { %v245_v20 = vpop.f32.mrf.mxu0 }
  0xb4   :  { %v273_v21 = vpop.f32.mrf.mxu1 }
  0xb5   :  { %v274_v22 = vadd.f32 %v273_v21, %v245_v20 }
  0xb7   :  { %v281_v23 = vadd.f32 %v1613_v19, %v274_v22 }
  0xb9   :  { %v1385_v24 = vmul.f32 -1.442695, %v281_v23  ;;  %v332_v26 = vpop.f32.mrf.mxu2 }
  0xbb   :  { %1622 = vpow2.f32 %v1385_v24  ;;  %v247_v29 = vpop.f32.mrf.mxu0 }
  0xbc   :  { %v357_v27 = vpop.f32.mrf.mxu3  ;;  %v275_v30 = vpop.f32.mrf.mxu1 }
  0xbd   :  { %v358_v28 = vadd.f32 %v357_v27, %v332_v26 }
  0xbf   :  { %v366_v31 = vadd.f32 %v1614_v25, %v358_v28  ;;  %v211_v28 = vld [vmem:[#allocation7] sm:$0xff] }
  0xc1   :  { %v1404_v32 = vmul.f32 -1.442695, %v366_v31  ;;  %v1623_v34 = vpop.eup %1622  ;;  %v334_v36 = vpop.f32.mrf.mxu2 }
  0xc2   :  { %v2162_v35 = vadd.f32 1.0, %v1623_v34 }
  0xc3   :  { %1624 = vpow2.f32 %v1404_v32  ;;  %v417_v38 = vpop.f32.mrf.mxu0 }
  0xc4   :  { %v359_v37 = vpop.f32.mrf.mxu3  ;;  %1626 = vrcp.f32 %v2162_v35  ;;  %v442_v39 = vpop.f32.mrf.mxu1  ;;  %vm291_vm1 = vweird.f32 %v2162_v35  ;;  %v297_v5 = vand.u32 2147483648, %v2162_v35  ;;  %v295_v17 = vand.u32 2147483647, %v2162_v35 }
  0xc5   :  { %v443_v54 = vadd.f32 %v442_v39, %v417_v38 }
  0xc6   :  { %v298_v20 = vor.u32 1.1754944e-38, %v297_v5  ;;  %vm296_vm6 = vcmp.eq.f32.partialorder %v295_v17, 8.507059e+37 }
  0xc7   :  { %v451_v0 = vadd.f32 %v1615_v55, %v443_v54 }
  0xc9   :  { %v1625_v46 = vpop.eup %1624  ;;  %v484_v56 = vpop.f32.mrf.mxu2 }
  0xca   :  { %v2167_v48 = vadd.f32 1.0, %v1625_v46  ;;  %v2171_v50 = vpop.eup %1626 }
  0xcb   :  { %v287_v53 = vmul.f32 %v2171_v50, %v2162_v35  ;;  %v419_v59 = vpop.f32.mrf.mxu0  ;;  %vm292_vm2 = vweird.f32 %v2171_v50 }
  0xcc   :  { %1628 = vrcp.f32 %v2167_v48  ;;  %v509_v57 = vpop.f32.mrf.mxu3  ;;  %v444_v60 = vpop.f32.mrf.mxu1  ;;  %v382_v18 = vand.u32 2147483648, %v2167_v48  ;;  %vm2190_vm3 = vmor %vm291_vm1, %vm292_vm2  ;;  %v380_v23 = vand.u32 2147483647, %v2167_v48  ;;  %vm376_vm5 = vweird.f32 %v2167_v48 }
  0xcd   :  { %v510_v58 = vadd.f32 %v509_v57, %v484_v56  ;;  %v288_v61 = vsub.f32 1.0, %v287_v53  ;;  %v1617_v57 = vld [vmem:[#allocation16] ss:$0 sm:$0xff] }
  0xce   :  { %v383_v27 = vor.u32 1.1754944e-38, %v382_v18  ;;  %vm381_vm8 = vcmp.eq.f32.partialorder %v380_v23, 8.507059e+37 }
  0xcf   :  { %v518_v62 = vadd.f32 %v1616_v51, %v510_v58  ;;  %v289_v63 = vmul.f32 %v2171_v50, %v288_v61 }
  0xd1   :  { %v1441_v1 = vmul.f32 -1.442695, %v518_v62  ;;  %v290_v9 = vadd.f32 %v2171_v50, %v289_v63  ;;  %v486_v12 = vpop.f32.mrf.mxu2  ;;  %v1618_v62 = vld [vmem:[#allocation16 + $0x1] ss:$0 sm:$0xff] }
  0xd2   :  { %v1629_v4 = vpop.eup %1628 }
  0xd3   :  { %v372_v8 = vmul.f32 %v1629_v4, %v2167_v48  ;;  %1630 = vpow2.f32 %v1441_v1  ;;  %vm377_vm4 = vweird.f32 %v1629_v4  ;;  %v294_v22 = vsel %vm2190_vm3, %v2171_v50, %v290_v9  ;;  %v583_v50 = vpop.f32.mrf.mxu0 }
  0xd4   :  { %1632 = vtanh.f32 %v451_v0  ;;  %v511_v13 = vpop.f32.mrf.mxu3  ;;  %vm378_vm7 = vmor %vm376_vm5, %vm377_vm4  ;;  %v299_v29 = vsel %vm296_vm6, %v298_v20, %v294_v22  ;;  %v1568_v20 = vld [vmem:[%s2376_s10 + $0x8] sm:$0xff] }
  0xd5   :  { %v373_v16 = vsub.f32 1.0, %v372_v8 }
  0xd7   :  { %v374_v21 = vmul.f32 %v1629_v4, %v373_v16  ;;  %v1619_v16 = vld [vmem:[#allocation16 + $0x2] ss:$0 sm:$0xff] }
  0xd9   :  { %v1631_v24 = vpop.eup %1630  ;;  %v375_v25 = vadd.f32 %v1629_v4, %v374_v21  ;;  %v670_v43 = vpop.f32.mrf.mxu2 }
  0xda   :  { %v1633_v26 = vpop.eup %1632  ;;  %v522_v30 = vadd.f32 1.0, %v1631_v24 }
  0xdb   :  { %v379_v31 = vsel %vm378_vm7, %v1629_v4, %v375_v25  ;;  %v539_v34 = vmul.f32 %v1633_v26, %v299_v29  ;;  %v585_v52 = vpop.f32.mrf.mxu0  ;;  %v1567_v25 = vld [vmem:[%s2376_s10] sm:$0xff] }
  0xdc   :  { %v384_v32 = vsel %vm381_vm8, %v383_v27, %v379_v31  ;;  %1634 = vrcp.f32 %v522_v30  ;;  %v534_v39 = vand.u32 2147483648, %v522_v30  ;;  %v532_v41 = vand.u32 2147483647, %v522_v30 }
  0xdd   :  { %v538_v33 = vmul.f32 %v384_v32, %v211_v28  ;;  %vm528_vm10 = vweird.f32 %v522_v30 }
  0xde   :  { %v535_v44 = vor.u32 1.1754944e-38, %v534_v39  ;;  %vm533_vm12 = vcmp.eq.f32.partialorder %v532_v41, 8.507059e+37  ;;  %v550_v41 = vld [vmem:[#allocation7 + $0x8] sm:$0xff] }
  0xdf   :  { %v540_v35 = vadd.f32 %v539_v34, %v538_v33 }
  0xe1   :  { %544 = vst.msk [vmem:[#allocation24] sm:$0xff] %vm232_vm0, %v540_v35  ;;  %1636 = vtanh.f32 %v540_v35  ;;  %v672_v51 = vpop.f32.mrf.mxu2 }
  0xe2   :  { %v1635_v36 = vpop.eup %1634 }
  0xe3   :  { %v524_v37 = vmul.f32 %v1635_v36, %v522_v30  ;;  %vm529_vm9 = vweird.f32 %v1635_v36  ;;  %v755_v54 = vpop.f32.mrf.mxu0 }
  0xe4   :  { %vm530_vm11 = vmor %vm528_vm10, %vm529_vm9  ;;  %vm977_vm10 = vcmask 1041409  }
  0xe5   :  { %v525_v38 = vsub.f32 1.0, %v524_v37 }
  0xe7   :  { %v526_v40 = vmul.f32 %v1635_v36, %v525_v38  ;;  %v1637_v46 = vpop.eup %1636 }
  0xe9   :  { %v527_v42 = vadd.f32 %v1635_v36, %v526_v40  ;;  %v822_v53 = vpop.f32.mrf.mxu2 }
  0xeb   :  { %v531_v45 = vsel %vm530_vm11, %v1635_v36, %v527_v42  ;;  %v757_v56 = vpop.f32.mrf.mxu0  ;;  %vm979_vm11 = vcmask 1042434  }
  0xec   :  { %v536_v47 = vsel %vm533_vm12, %v535_v44, %v531_v45  ;;  %vm981_vm12 = vcmask 1043459  }
  0xed   :  { %v542_v48 = vmul.f32 %v1637_v46, %v536_v47 }
  0xef   :  { %v545_v49 = vpack.c.bf16 %v542_v48, %v542_v48  ;;  %543 = vst.msk [vmem:[#allocation22] sm:$0xff] %vm232_vm0, %v542_v48 }
  0xf1   :  { %1459 = vmatmul.msk.bf16.vlgmr.msra.gmra.mxu1 %vm232_vm0, %v545_v49  ;;  %1478 = vmatmul.msk.bf16.vlgmr.msra.gmra.mxu3 %vm232_vm0, %v545_v49  ;;  %v824_v55 = vpop.f32.mrf.mxu2 }
  0xf2   :  { %1297 = vmatpush.bf16.msra.mxu1 %v1568_v20 }
  0xf6   :  { %1298 = vmatpush.bf16.msra.mxu1 %v1567_v25 }
 0x101   :  { %1497 = vmatmul.msk.bf16.vlgmr.msrb.gmra.mxu1 %vm232_vm0, %v545_v49  ;;  %1515 = vmatmul.msk.bf16.vlgmr.msrb.gmra.mxu3 %vm232_vm0, %v545_v49 }
 0x16e   :  { %v611_v58 = vpop.f32.mrf.mxu1 }
 0x16f   :  { %v612_v59 = vadd.f32 %v611_v58, %v583_v50 }
 0x171   :  { %v619_v60 = vadd.f32 %v1617_v57, %v612_v59 }
 0x173   :  { %v1460_v61 = vmul.f32 -1.442695, %v619_v60 }
 0x174   :  { %v695_v63 = vpop.f32.mrf.mxu3 }
 0x175   :  { %1638 = vpow2.f32 %v1460_v61  ;;  %v696_v0 = vadd.f32 %v695_v63, %v670_v43  ;;  %v2225_v61 = vld [vmem:[%s2369_s3] sm:$0xff]   ;;  %v2230_v63 = vld [vmem:[%s2369_s3 + $0x10] sm:$0xff]  }
 0x176   :  { %v613_v1 = vpop.f32.mrf.mxu1  ;;  %v1582_v20 = vunpack.c.h.bf16 %v2230_v63 }
 0x177   :  { %v704_v2 = vadd.f32 %v1618_v62, %v696_v0  ;;  %v2235_v0 = vld [vmem:[%s2369_s3 + $0x8] sm:$0xff]  }
 0x179   :  { %v1479_v3 = vmul.f32 -1.442695, %v704_v2  ;;  %v1573_v2 = vunpack.c.l.bf16 %v2225_v61 }
 0x17b   :  { %v1639_v4 = vpop.eup %1638  ;;  %1640 = vpow2.f32 %v1479_v3  ;;  %v1581_v3 = vunpack.c.l.bf16 %v2230_v63 }
 0x17c   :  { %v623_v5 = vadd.f32 1.0, %v1639_v4  ;;  %v697_v6 = vpop.f32.mrf.mxu3  ;;  %v1577_v4 = vunpack.c.l.bf16 %v2235_v0 }
 0x17e   :  { %1642 = vrcp.f32 %v623_v5  ;;  %v780_v7 = vpop.f32.mrf.mxu1  ;;  %v635_v28 = vand.u32 2147483648, %v623_v5  ;;  %vm629_vm14 = vweird.f32 %v623_v5  ;;  %v633_v31 = vand.u32 2147483647, %v623_v5 }
 0x17f   :  { %v781_v15 = vadd.f32 %v780_v7, %v755_v54 }
 0x180   :  { %v636_v37 = vor.u32 1.1754944e-38, %v635_v28  ;;  %vm634_vm3 = vcmp.eq.f32.partialorder %v633_v31, 8.507059e+37 }
 0x181   :  { %v1641_v8 = vpop.eup %1640  ;;  %v789_v24 = vadd.f32 %v1619_v16, %v781_v15 }
 0x182   :  { %v708_v9 = vadd.f32 1.0, %v1641_v8 }
 0x184   :  { %v1643_v11 = vpop.eup %1642  ;;  %1644 = vrcp.f32 %v708_v9  ;;  %v847_v12 = vpop.f32.mrf.mxu3  ;;  %v720_v32 = vand.u32 2147483648, %v708_v9  ;;  %v718_v36 = vand.u32 2147483647, %v708_v9  ;;  %vm714_vm2 = vweird.f32 %v708_v9 }
 0x185   :  { %v625_v13 = vmul.f32 %v1643_v11, %v623_v5  ;;  %v848_v14 = vadd.f32 %v847_v12, %v822_v53  ;;  %vm630_vm13 = vweird.f32 %v1643_v11 }
 0x186   :  { %v782_v17 = vpop.f32.mrf.mxu1  ;;  %vm2215_vm15 = vmor %vm629_vm14, %vm630_vm13  ;;  %v721_v40 = vor.u32 1.1754944e-38, %v720_v32  ;;  %vm719_vm5 = vcmp.eq.f32.partialorder %v718_v36, 8.507059e+37  ;;  %vm983_vm13 = vcmask 1044484   ;;  %vm985_vm14 = vcmask 1045509  }
 0x187   :  { %v626_v18 = vsub.f32 1.0, %v625_v13  ;;  %v856_v19 = vadd.f32 %v1620_v10, %v848_v14  ;;  %v1574_v14 = vunpack.c.h.bf16 %v2225_v61 }
 0x189   :  { %v627_v21 = vmul.f32 %v1643_v11, %v626_v18  ;;  %v1516_v22 = vmul.f32 -1.442695, %v856_v19 }
 0x18a   :  { %v1645_v23 = vpop.eup %1644 }
 0x18b   :  { %v710_v26 = vmul.f32 %v1645_v23, %v708_v9  ;;  %v628_v27 = vadd.f32 %v1643_v11, %v627_v21  ;;  %1646 = vpow2.f32 %v1516_v22  ;;  %vm715_vm1 = vweird.f32 %v1645_v23 }
 0x18c   :  { %v849_v29 = vpop.f32.mrf.mxu3  ;;  %1648 = vtanh.f32 %v789_v24  ;;  %vm716_vm4 = vmor %vm714_vm2, %vm715_vm1  ;;  %v1578_v22 = vunpack.c.h.bf16 %v2235_v0  ;;  %vm989_vm1 = vcmask 1047559   ;;  %vm992_vm2 = vcmask 64512  }
 0x18d   :  { %v711_v30 = vsub.f32 1.0, %v710_v26  ;;  %v632_v35 = vsel %vm2215_vm15, %v1643_v11, %v628_v27  ;;  %v2260_v29 = vld [vmem:[%s2369_s3 + $0x18] sm:$0xff]   ;;  %vm987_vm15 = vcmask 1046534  }
 0x18e   :  { %v637_v42 = vsel %vm634_vm3, %v636_v37, %v632_v35 }
 0x18f   :  { %v712_v34 = vmul.f32 %v1645_v23, %v711_v30 }
 0x191   :  { %v1647_v38 = vpop.eup %1646  ;;  %v713_v39 = vadd.f32 %v1645_v23, %v712_v34  ;;  %v1585_v34 = vunpack.c.l.bf16 %v2260_v29 }
 0x192   :  { %v860_v44 = vadd.f32 1.0, %v1647_v38  ;;  %v1649_v46 = vpop.eup %1648  ;;  %v1586_v38 = vunpack.c.h.bf16 %v2260_v29 }
 0x193   :  { %v717_v45 = vsel %vm716_vm4, %v1645_v23, %v713_v39  ;;  %v877_v49 = vmul.f32 %v1649_v46, %v637_v42  ;;  %v967_v46 = vlaneseq }
 0x194   :  { %v722_v47 = vsel %vm719_vm5, %v721_v40, %v717_v45  ;;  %1650 = vrcp.f32 %v860_v44  ;;  %v872_v53 = vand.u32 2147483648, %v860_v44  ;;  %v870_v55 = vand.u32 2147483647, %v860_v44 }
 0x195   :  { %v876_v48 = vmul.f32 %v722_v47, %v550_v41  ;;  %vm866_vm7 = vweird.f32 %v860_v44 }
 0x196   :  { %v873_v57 = vor.u32 1.1754944e-38, %v872_v53  ;;  %vm871_vm9 = vcmp.eq.f32.partialorder %v870_v55, 8.507059e+37 }
 0x197   :  { %v878_v43 = vadd.f32 %v877_v49, %v876_v48  ;;  %v2277_v49 = vand.u32 127, %v967_v46 }
 0x199   :  { %884 = vst.msk [vmem:[#allocation24 + $0x8] sm:$0xff] %vm232_vm0, %v878_v43  ;;  %1652 = vtanh.f32 %v878_v43 }
 0x19a   :  { %v1651_v50 = vpop.eup %1650 }
 0x19b   :  { %v862_v51 = vmul.f32 %v1651_v50, %v860_v44  ;;  %vm867_vm6 = vweird.f32 %v1651_v50 }
 0x19c   :  { %vm868_vm8 = vmor %vm866_vm7, %vm867_vm6 }
 0x19d   :  { %v863_v52 = vsub.f32 1.0, %v862_v51 }
 0x19f   :  { %v864_v54 = vmul.f32 %v1651_v50, %v863_v52  ;;  %v1653_v59 = vpop.eup %1652 }
 0x1a1   :  { %v865_v56 = vadd.f32 %v1651_v50, %v864_v54 }
 0x1a3   :  { %v869_v58 = vsel %vm868_vm8, %v1651_v50, %v865_v56 }
 0x1a4   :  { %v874_v60 = vsel %vm871_vm9, %v873_v57, %v869_v58 }
 0x1a5   :  { %v880_v62 = vmul.f32 %v1653_v59, %v874_v60 }
 0x1a7   :  { %885 = vst.msk [vmem:[#allocation2] sm:$0xff] %vm232_vm0, %v880_v62  ;;  %v902_v1 = vmul.f32 0.17677669, %v880_v62 }
 0x1a8   :  { %882 = vst.msk [vmem:[#allocation22 + $0x8] sm:$0xff] %vm232_vm0, %v880_v62 }
 0x1a9   :  { %v911_v5 = vperm.slane %v902_v1, 0  ;;  %v907_v6 = vrot.slane %v902_v1, 4  ;;  %v905_v7 = vrot.slane %v902_v1, 2  ;;  %v904_v8 = vrot.slane %v902_v1, 1  ;;  %1333 = dma.vmem_to_hbm [thread:$0]  %s1326_s6, 256, %s1328_s21, [#allocation23], %s2001_s23, %s2001_s23, %s2002_s24  }
 0x1aa   :  { %v908_v9 = vrot.slane %v902_v1, 5  ;;  %v906_v13 = vrot.slane %v902_v1, 3  ;;  %v909_v28 = vrot.slane %v902_v1, 6  ;;  %v910_v32 = vrot.slane %v902_v1, 7  ;;  %1346 = dma.vmem_to_hbm [thread:$0]  %s1339_s2, 256, %s1341_s1, [#allocation23], %s2001_s23, %s2001_s23, %s2002_s24  }
 0x1ab   :  { %v927_v10 = vmul.f32 %v1573_v2, %v911_v5  ;;  %v915_v11 = vperm.slane %v907_v6, 0  ;;  %v913_v12 = vperm.slane %v905_v7, 0  ;;  %v912_v18 = vperm.slane %v904_v8, 0 }
 0x1ac   :  { %v916_v21 = vperm.slane %v908_v9, 0  ;;  %v914_v26 = vperm.slane %v906_v13, 0  ;;  %v917_v35 = vperm.slane %v909_v28, 0  ;;  %v918_v39 = vperm.slane %v910_v32, 0 }
 0x1ad   :  { %v935_v15 = vsel %vm232_vm0, %v927_v10, 0.0  ;;  %v931_v16 = vmul.f32 %v1581_v3, %v915_v11  ;;  %v929_v17 = vmul.f32 %v1577_v4, %v913_v12  ;;  %v928_v27 = vmul.f32 %v1574_v14, %v912_v18 }
 0x1ae   :  { %936 = vadd.xlane.f32.xlu0 %v935_v15  ;;  %v1235_v19 = vld [vmem:[#allocation2] sm:$0xff]  ;;  %v932_v30 = vmul.f32 %v1582_v20, %v916_v21  ;;  %v930_v31 = vmul.f32 %v1578_v22, %v914_v26  ;;  %v933_v40 = vmul.f32 %v1585_v34, %v917_v35  ;;  %v934_v41 = vmul.f32 %v1586_v38, %v918_v39 }
 0x1af   :  { %v947_v23 = vsel %vm232_vm0, %v931_v16, 0.0  ;;  %v941_v24 = vsel %vm232_vm0, %v929_v17, 0.0  ;;  %v1236_v25 = vpack.c.bf16 %v1235_v19, %v1235_v19  ;;  %v938_v33 = vsel %vm232_vm0, %v928_v27, 0.0 }
 0x1b0   :  { %948 = vadd.xlane.f32.xlu2 %v947_v23  ;;  %942 = vadd.xlane.f32.xlu1 %v941_v24  ;;  %v950_v36 = vsel %vm232_vm0, %v932_v30, 0.0  ;;  %v944_v37 = vsel %vm232_vm0, %v930_v31, 0.0  ;;  %v953_v42 = vsel %vm232_vm0, %v933_v40, 0.0  ;;  %v956_v44 = vsel %vm232_vm0, %v934_v41, 0.0 }
 0x1b1   :  { %1534 = vmatmul.msk.bf16.vlgmr.msra.gmra.mxu1 %vm232_vm0, %v1236_v25  ;;  %v2016_v15 = vmov 0  }
 0x1b2   :  { %1612 = vset.pattern.permute.xlu2 %v2016_v15  ;;  %1611 = vset.pattern.permute.xlu1 %v2016_v15 }
 0x1b3   :  { %1610 = vset.pattern.permute.xlu0 %v2016_v15 }
 0x1b6   :  { %939 = vadd.xlane.f32.xlu0 %v938_v33 }
 0x1b8   :  { %951 = vadd.xlane.f32.xlu2 %v950_v36  ;;  %945 = vadd.xlane.f32.xlu1 %v944_v37 }
 0x1be   :  { %954 = vadd.xlane.f32.xlu0 %v953_v42 }
 0x1c0   :  { %957 = vadd.xlane.f32.xlu1 %v956_v44 }
 0x221   :  { %v937_v45 = vpop.xlane.xlu0 %936 }
 0x222   :  { %v969_v50 = vperm.slane %v937_v45, %v2277_v49 }
 0x223   :  { %v943_v47 = vpop.xlane.xlu1 %942  ;;  %v949_v48 = vpop.xlane.xlu2 %948 }
 0x224   :  { %v971_v52 = vperm.slane %v943_v47, %v2277_v49  ;;  %v973_v57 = vperm.slane %v949_v48, %v2277_v49 }
 0x229   :  { %v940_v43 = vpop.xlane.xlu0 %939 }
 0x22a   :  { %v970_v51 = vperm.slane %v940_v43, %v2277_v49 }
 0x22b   :  { %v946_v53 = vpop.xlane.xlu1 %945  ;;  %v952_v58 = vpop.xlane.xlu2 %951 }
 0x22c   :  { %v978_v54 = vsel %vm977_vm10, %v970_v51, %v969_v50  ;;  %v972_v55 = vperm.slane %v946_v53, %v2277_v49  ;;  %v974_v1 = vperm.slane %v952_v58, %v2277_v49 }
 0x22d   :  { %v980_v56 = vsel %vm979_vm11, %v971_v52, %v978_v54 }
 0x22e   :  { %v982_v59 = vsel %vm981_vm12, %v972_v55, %v980_v56  ;;  %v2287_v60 = vpop.f32.mrf.mxu1 }
 0x22f   :  { %v984_v62 = vsel %vm983_vm13, %v973_v57, %v982_v59 }
 0x230   :  { %v986_v8 = vsel %vm985_vm14, %v974_v1, %v984_v62 }
 0x231   :  { %v955_v5 = vpop.xlane.xlu0 %954 }
 0x232   :  { %v975_v6 = vperm.slane %v955_v5, %v2277_v49 }
 0x233   :  { %v958_v7 = vpop.xlane.xlu1 %957 }
 0x234   :  { %v976_v9 = vperm.slane %v958_v7, %v2277_v49  ;;  %v988_v10 = vsel %vm987_vm15, %v975_v6, %v986_v8 }
 0x236   :  { %v1302_v11 = vpop.f32.mrf.mxu1  ;;  %v990_v12 = vsel %vm989_vm1, %v976_v9, %v988_v10 }
 0x237   :  { %v993_v13 = vsel %vm992_vm2, %v990_v12, -inf }
 0x238   :  { %994 = vmax.xlane.f32.xlu2 %v993_v13 }
 0x2ab   :  { %v995_v16 = vpop.xlane.xlu2 %994 }
 0x2ac   :  { %v999_v17 = vperm.slane %v995_v16, 2  ;;  %v998_v18 = vperm.slane %v995_v16, 1  ;;  %v997_v19 = vperm.slane %v995_v16, 0  ;;  %v1000_v25 = vperm.slane %v995_v16, 3 }
 0x2ad   :  { %v1001_v26 = vperm.slane %v995_v16, 4  ;;  %v1004_v27 = vperm.slane %v995_v16, 7  ;;  %v1002_v37 = vperm.slane %v995_v16, 5  ;;  %v1003_v40 = vperm.slane %v995_v16, 6 }
 0x2ae   :  { %v1015_v21 = vsub.f32 %v943_v47, %v999_v17  ;;  %v1014_v23 = vsub.f32 %v940_v43, %v998_v18  ;;  %v1013_v24 = vsub.f32 %v937_v45, %v997_v19  ;;  %v1016_v32 = vsub.f32 %v946_v53, %v1000_v25 }
 0x2af   :  { %v1017_v33 = vsub.f32 %v949_v48, %v1001_v26  ;;  %v1020_v35 = vsub.f32 %v958_v7, %v1004_v27  ;;  %v1018_v46 = vsub.f32 %v952_v58, %v1002_v37  ;;  %v1019_v47 = vsub.f32 %v955_v5, %v1003_v40 }
 0x2b0   :  { %v1025_v28 = vmul.f32 1.442695, %v1015_v21  ;;  %v1023_v30 = vmul.f32 1.442695, %v1014_v23  ;;  %v1021_v31 = vmul.f32 1.442695, %v1013_v24 }
 0x2b1   :  { %v1027_v36 = vmul.f32 1.442695, %v1016_v32  ;;  %v1029_v39 = vmul.f32 1.442695, %v1017_v33  ;;  %v1035_v42 = vmul.f32 1.442695, %v1020_v35 }
 0x2b2   :  { %1654 = vpow2.f32 %v1025_v28  ;;  %v1031_v48 = vmul.f32 1.442695, %v1018_v46  ;;  %v1033_v43 = vmul.f32 1.442695, %v1019_v47 }
 0x2b3   :  { %1656 = vpow2.f32 %v1023_v30 }
 0x2b4   :  { %1658 = vpow2.f32 %v1021_v31 }
 0x2b5   :  { %1660 = vpow2.f32 %v1027_v36 }
 0x2b6   :  { %1662 = vpow2.f32 %v1029_v39 }
 0x2b7   :  { %1664 = vpow2.f32 %v1035_v42 }
 0x2b8   :  { %v2297_v41 = vpop.eup %1654  ;;  %1666 = vpow2.f32 %v1031_v48 }
 0x2b9   :  { %v1657_v44 = vpop.eup %1656  ;;  %1052 = vperm.xlu2 %1612, %v2297_v41   ;;  %1668 = vpow2.f32 %v1033_v43 }
 0x2ba   :  { %v1659_v45 = vpop.eup %1658  ;;  %1049 = vperm.xlu1 %1611, %v1657_v44  }
 0x2bb   :  { %1046 = vperm.xlu0 %1610, %v1659_v45   ;;  %v1661_v50 = vpop.eup %1660 }
 0x2bc   :  { %v1663_v51 = vpop.eup %1662 }
 0x2bd   :  { %v1665_v52 = vpop.eup %1664 }
 0x2be   :  { %v1667_v53 = vpop.eup %1666 }
 0x2bf   :  { %v1669_v54 = vpop.eup %1668 }
 0x2c1   :  { %1055 = vperm.xlu2 %1612, %v1661_v50  }
 0x2c2   :  { %1058 = vperm.xlu1 %1611, %v1663_v51  }
 0x2c3   :  { %1067 = vperm.xlu0 %1610, %v1665_v52  }
 0x2c9   :  { %1061 = vperm.xlu2 %1612, %v1667_v53  }
 0x2ca   :  { %1064 = vperm.xlu1 %1611, %v1669_v54  }
 0x313   :  { %v1053_v55 = vpop.permute.xlu2 %1052 }
 0x314   :  { %v1071_v6 = vperm.slane %v1053_v55, %v2277_v49 }
 0x31b   :  { %v1056_v58 = vpop.permute.xlu2 %1055 }
 0x31c   :  { %v1072_v9 = vperm.slane %v1056_v58, %v2277_v49 }
 0x323   :  { %v1062_v10 = vpop.permute.xlu2 %1061 }
 0x324   :  { %v1074_v15 = vperm.slane %v1062_v10, %v2277_v49 }
 0x32c   :  { %v1050_v56 = vpop.permute.xlu1 %1049 }
 0x32d   :  { %v1047_v57 = vpop.permute.xlu0 %1046  ;;  %v1070_v59 = vperm.slane %v1050_v56, %v2277_v49 }
 0x32e   :  { %v1069_v62 = vperm.slane %v1047_v57, %v2277_v49 }
 0x330   :  { %v1077_v1 = vsel %vm977_vm10, %v1070_v59, %v1069_v62 }
 0x331   :  { %v1078_v7 = vsel %vm979_vm11, %v1071_v6, %v1077_v1 }
 0x332   :  { %v1079_v11 = vsel %vm981_vm12, %v1072_v9, %v1078_v7 }
 0x334   :  { %v1059_v5 = vpop.permute.xlu1 %1058 }
 0x335   :  { %v1073_v8 = vperm.slane %v1059_v5, %v2277_v49  ;;  %v1068_v13 = vpop.permute.xlu0 %1067  ;;  %v1569_v5 = vld [vmem:[#allocation18] sm:$0xff] }
 0x336   :  { %v1076_v18 = vperm.slane %v1068_v13, %v2277_v49 }
 0x337   :  { %v1080_v12 = vsel %vm983_vm13, %v1073_v8, %v1079_v11 }
 0x338   :  { %v1081_v19 = vsel %vm985_vm14, %v1074_v15, %v1080_v12 }
 0x33c   :  { %v1065_v16 = vpop.permute.xlu1 %1064 }
 0x33d   :  { %v1075_v17 = vperm.slane %v1065_v16, %v2277_v49 }
 0x33f   :  { %v1082_v21 = vsel %vm987_vm15, %v1075_v17, %v1081_v19 }
 0x340   :  { %v1083_v23 = vsel %vm989_vm1, %v1076_v18, %v1082_v21 }
 0x341   :  { %v1085_v24 = vsel %vm992_vm2, %v1083_v23, 0.0 }
 0x342   :  { %1086 = vadd.xlane.f32.xlu2 %v1085_v24 }
 0x3b5   :  { %v1087_v25 = vpop.xlane.xlu2 %1086 }
 0x3b6   :  { %1670 = vrcp.f32 %v1087_v25 }
 0x3bc   :  { %v1671_v26 = vpop.eup %1670 }
 0x3bd   :  { %v1091_v27 = vperm.slane %v1671_v26, 1  ;;  %v1090_v28 = vperm.slane %v1671_v26, 0  ;;  %v1093_v32 = vperm.slane %v1671_v26, 3  ;;  %v1092_v49 = vperm.slane %v1671_v26, 2 }
 0x3be   :  { %v1095_v36 = vperm.slane %v1671_v26, 5  ;;  %v1094_v37 = vperm.slane %v1671_v26, 4  ;;  %v1097_v42 = vperm.slane %v1671_v26, 7  ;;  %v1096_v46 = vperm.slane %v1671_v26, 6 }
 0x3bf   :  { %v1107_v30 = vmul.f32 %v1657_v44, %v1091_v27  ;;  %v1106_v31 = vmul.f32 %v1659_v45, %v1090_v28  ;;  %v1109_v33 = vmul.f32 %v1661_v50, %v1093_v32  ;;  %v1108_v35 = vmul.f32 %v2297_v41, %v1092_v49 }
 0x3c0   :  { %v1111_v39 = vmul.f32 %v1667_v53, %v1095_v36  ;;  %v1110_v40 = vmul.f32 %v1663_v51, %v1094_v37  ;;  %v1113_v47 = vmul.f32 %v1665_v52, %v1097_v42  ;;  %v1112_v44 = vmul.f32 %v1669_v54, %v1096_v46 }
 0x3c1   :  { %1121 = vperm.xlu0 %1610, %v1107_v30   ;;  %1116 = vperm.xlu1 %1611, %v1106_v31  }
 0x3c9   :  { %1131 = vperm.xlu0 %1610, %v1109_v33   ;;  %1126 = vperm.xlu1 %1611, %v1108_v35  }
 0x3d1   :  { %1141 = vperm.xlu0 %1610, %v1111_v39   ;;  %1136 = vperm.xlu1 %1611, %v1110_v40  }
 0x3d9   :  { %1151 = vperm.xlu0 %1610, %v1113_v47   ;;  %1146 = vperm.xlu1 %1611, %v1112_v44  }
 0x433   :  { %v1122_v45 = vpop.permute.xlu0 %1121  ;;  %v1117_v48 = vpop.permute.xlu1 %1116 }
 0x434   :  { %v1155_v43 = vmul.f32 %v1574_v14, %v1122_v45  ;;  %v1154_v41 = vmul.f32 %v1573_v2, %v1117_v48  ;;  %v1570_v14 = vld [vmem:[#allocation18 + $0x8] sm:$0xff] }
 0x435   :  { %1269 = vmatpush.bf16.msra.mxu0 %v1570_v14 }
 0x436   :  { %v1169_v50 = vsel %vm232_vm0, %v1155_v43, 0.0  ;;  %v1162_v51 = vsel %vm232_vm0, %v1154_v41, 0.0 }
 0x437   :  { %v1170_v53 = vrot.slane %v1169_v50, 4  ;;  %v1163_v55 = vrot.slane %v1162_v51, 4 }
 0x439   :  { %v1171_v58 = vadd.f32 %v1170_v53, %v1169_v50  ;;  %v1164_v59 = vadd.f32 %v1163_v55, %v1162_v51  ;;  %1270 = vmatpush.bf16.msra.mxu0 %v1569_v5 }
 0x43b   :  { %v1132_v56 = vpop.permute.xlu0 %1131  ;;  %v1127_v57 = vpop.permute.xlu1 %1126  ;;  %v1172_v6 = vrot.slane %v1171_v58, 2  ;;  %v1165_v7 = vrot.slane %v1164_v59, 2 }
 0x43c   :  { %v1157_v52 = vmul.f32 %v1578_v22, %v1132_v56  ;;  %v1156_v54 = vmul.f32 %v1577_v4, %v1127_v57 }
 0x43d   :  { %v1173_v12 = vadd.f32 %v1172_v6, %v1171_v58  ;;  %v1166_v13 = vadd.f32 %v1165_v7, %v1164_v59  ;;  %v1621_v6 = vld [vmem:[#allocation19] ss:$0 sm:$0xff] }
 0x43e   :  { %v1183_v61 = vsel %vm232_vm0, %v1157_v52, 0.0  ;;  %v1176_v2 = vsel %vm232_vm0, %v1156_v54, 0.0 }
 0x43f   :  { %v1184_v62 = vrot.slane %v1183_v61, 4  ;;  %v1177_v1 = vrot.slane %v1176_v2, 4  ;;  %v1174_v23 = vrot.slane %v1173_v12, 1  ;;  %v1167_v24 = vrot.slane %v1166_v13, 1 }
 0x441   :  { %v1178_v8 = vadd.f32 %v1177_v1, %v1176_v2  ;;  %v1185_v9 = vadd.f32 %v1184_v62, %v1183_v61  ;;  %v1175_v49 = vadd.f32 %v1174_v23, %v1173_v12  ;;  %v1168_v33 = vadd.f32 %v1167_v24, %v1166_v13 }
 0x443   :  { %v1179_v10 = vrot.slane %v1178_v8, 2  ;;  %v1142_v22 = vpop.permute.xlu0 %1141  ;;  %v1137_v11 = vpop.permute.xlu1 %1136  ;;  %v1186_v15 = vrot.slane %v1185_v9, 2 }
 0x444   :  { %v1159_v0 = vmul.f32 %v1582_v20, %v1142_v22  ;;  %v1158_v4 = vmul.f32 %v1581_v3, %v1137_v11 }
 0x445   :  { %v1180_v18 = vadd.f32 %v1179_v10, %v1178_v8  ;;  %v1187_v27 = vadd.f32 %v1186_v15, %v1185_v9 }
 0x446   :  { %v1197_v16 = vsel %vm232_vm0, %v1159_v0, 0.0  ;;  %v1190_v17 = vsel %vm232_vm0, %v1158_v4, 0.0 }
 0x447   :  { %v1198_v19 = vrot.slane %v1197_v16, 4  ;;  %v1191_v21 = vrot.slane %v1190_v17, 4  ;;  %v1181_v28 = vrot.slane %v1180_v18, 1  ;;  %v1188_v36 = vrot.slane %v1187_v27, 1 }
 0x449   :  { %v1199_v25 = vadd.f32 %v1198_v19, %v1197_v16  ;;  %v1192_v26 = vadd.f32 %v1191_v21, %v1190_v17  ;;  %v1182_v42 = vadd.f32 %v1181_v28, %v1180_v18  ;;  %v1189_v43 = vadd.f32 %v1188_v36, %v1187_v27 }
 0x44b   :  { %v1200_v20 = vrot.slane %v1199_v25, 2  ;;  %v1193_v30 = vrot.slane %v1192_v26, 2  ;;  %v1152_v63 = vpop.permute.xlu0 %1151  ;;  %v1147_v3 = vpop.permute.xlu1 %1146 }
 0x44c   :  { %v1161_v31 = vmul.f32 %v1586_v38, %v1152_v63  ;;  %v1160_v32 = vmul.f32 %v1585_v34, %v1147_v3  ;;  %v1226_v38 = vsel %vm977_vm10, %v1175_v49, %v1168_v33 }
 0x44d   :  { %v1194_v35 = vadd.f32 %v1193_v30, %v1192_v26  ;;  %v1201_v37 = vadd.f32 %v1200_v20, %v1199_v25  ;;  %v1227_v34 = vsel %vm979_vm11, %v1182_v42, %v1226_v38 }
 0x44e   :  { %v1211_v39 = vsel %vm232_vm0, %v1161_v31, 0.0  ;;  %v1204_v40 = vsel %vm232_vm0, %v1160_v32, 0.0  ;;  %v1228_v57 = vsel %vm981_vm12, %v1189_v43, %v1227_v34 }
 0x44f   :  { %v1195_v46 = vrot.slane %v1194_v35, 1  ;;  %v1212_v47 = vrot.slane %v1211_v39, 4  ;;  %v1205_v44 = vrot.slane %v1204_v40, 4  ;;  %v1202_v29 = vrot.slane %v1201_v37, 1 }
 0x451   :  { %v1213_v45 = vadd.f32 %v1212_v47, %v1211_v39  ;;  %v1206_v48 = vadd.f32 %v1205_v44, %v1204_v40  ;;  %v1196_v41 = vadd.f32 %v1195_v46, %v1194_v35  ;;  %v1203_v56 = vadd.f32 %v1202_v29, %v1201_v37 }
 0x453   :  { %v1214_v50 = vrot.slane %v1213_v45, 2  ;;  %v1207_v51 = vrot.slane %v1206_v48, 2  ;;  %v1229_v52 = vsel %vm983_vm13, %v1196_v41, %v1228_v57 }
 0x454   :  { %v1230_v61 = vsel %vm985_vm14, %v1203_v56, %v1229_v52 }
 0x455   :  { %v1215_v53 = vadd.f32 %v1214_v50, %v1213_v45  ;;  %v1208_v55 = vadd.f32 %v1207_v51, %v1206_v48 }
 0x457   :  { %v1216_v54 = vrot.slane %v1215_v53, 1  ;;  %v1209_v58 = vrot.slane %v1208_v55, 1 }
 0x459   :  { %v1217_v59 = vadd.f32 %v1216_v54, %v1215_v53  ;;  %v1210_v14 = vadd.f32 %v1209_v58, %v1208_v55 }
 0x45b   :  { %v1231_v2 = vsel %vm987_vm15, %v1210_v14, %v1230_v61 }
 0x45c   :  { %v1232_v62 = vsel %vm989_vm1, %v1217_v59, %v1231_v2 }
 0x45d   :  { %1234 = vst.msk [vmem:[#allocation3] sm:$0xff] %vm232_vm0, %v1232_v62 }
 0x464   :  { %v1241_v1 = vld [vmem:[#allocation3] sm:$0xff] }
 0x465   :  { %v1242_v5 = vpack.c.bf16 %v1241_v1, %v1241_v1 }
 0x467   :  { %1525 = vmatmul.msk.bf16.vlgmr.msra.gmra.mxu0 %vm232_vm0, %v1242_v5 }
 0x4e4   :  { %v1272_v7 = vpop.f32.mrf.mxu0 }
 0x4e5   :  { %v1301_v8 = vadd.f32 %v2287_v60, %v1272_v7 }
 0x4e7   :  { %v1308_v9 = vadd.f32 %v1621_v6, %v1301_v8 }
 0x4e9   :  { %1309 = vst [vmem:[#allocation21] sm:$0xff] %v1308_v9 }
 0x4ea   :  { %1320 = dma.vmem_to_hbm [thread:$0]  %s1316_s27, 128, %s1318_s17, [#allocation6]  }
 0x4ec   :  { %v1274_v10 = vpop.f32.mrf.mxu0 }
 0x4ed   :  { %1996 = dma.done.wait [#allocation6], 128  }
 0x4ee   :  { %1997 = vsyncadd [#allocation6], 4294967168 }
 0x4ef   :  { %1998 = dma.done.wait [#allocation23], 512  }
 0x4f0   :  { %1999 = vsyncadd [#allocation23], 4294966784 }
 0x4f1   :  { %1359 = vsyncpa [#allocation5], 1 }
 0x4f2   :  { %1360 = vsyncpa [#allocation8], 1 }
 0x4f3   :  { %1361 = vsyncpa [#allocation11], 1 }
 0x4f4   :  { %1362 = vsyncpa [#allocation14], 1 }
 0x4f5   :  { %1363 = vsyncpa [#allocation17], 1 }
 0x4f6   :  { %1364 = vsyncpa [#allocation20], 1 }
 0x4f7   :  { %1365 = vsyncpa [#allocation6], 1 }
 0x4f8   :  { %1366 = vsyncpa [#allocation23], 1 }

</bundles_post_ra>
